<compile_context>
chip_gen: v7x
topology: tpu7x:2x2x1
jax: 0.10.0
libtpu: 0.0.40
codegen_flags: <defaults>
</compile_context>

<pallas_src>
import numpy as np
import jax
import jax.numpy as jnp
from jax.experimental import pallas as pl
from jax.experimental.pallas import tpu as pltpu

# ---- small, module-consistent sizes -----------------------------------------
B, T = 2, 8        # real batch, (padded) sequence length
BP = 8             # batch padded to a full sublane tile
VOCAB = 50         # tokenizer vocab size (synthetic)
E = 32             # tokenizer embedding_dim
H = 16             # encoder_hidden_dim
LH = 16            # linear_hidden_dim

H2, H4, H6 = 2 * H, 4 * H, 6 * H
TB = T * BP                      # 64 rows of per-timestep data
NSEW_DIRS = ['north', 'south', 'east', 'west']

# ---- packed parameter buffer row layout (128 columns, 8-row aligned sections) -
R_WIH = 0                        # (2E, 6H) input->gates, block structured
R_WHH = R_WIH + 2 * E            # (2H, 6H) hidden->gates, block-diagonal
R_BIH = 96                       # (1, 6H)
R_BHH = 104                      # (1, 6H)
R_W1 = 112                       # (2H, 5*LH) fused [nsew x4 | door] first layers
R_B1 = 144                       # (1, 5*LH)
R_W2 = 152                       # (5*LH, 128) block-diag second layers (lane-dense)
R_B2 = 232                       # (1, 128)
N_ROWS = 240
W_COLS = 128


# ---- the Pallas kernel --------------------------------------------------------
def nav_kernel(in_ref, w_ref, out_ref):
    # ---- unpack parameters: static, 8-row-aligned slices of one buffer ----
    wih = w_ref[R_WIH:R_WIH + 2 * E, 0:H6]           # (2E, 6H)
    whh = w_ref[R_WHH:R_WHH + H2, 0:H6]              # (2H, 6H)
    bih = w_ref[R_BIH:R_BIH + 1, 0:H6]               # (1, 6H)
    bhh = w_ref[R_BHH:R_BHH + 1, 0:H6]               # (1, 6H)
    w1 = w_ref[R_W1:R_W1 + H2, 0:5 * LH]             # (2H, 5*LH)
    b1 = w_ref[R_B1:R_B1 + 1, 0:5 * LH]              # (1, 5*LH)
    w2 = w_ref[R_W2:R_W2 + 5 * LH, :]                # (5*LH, 128) block-diagonal
    b2 = w_ref[R_B2:R_B2 + 1, :]                     # (1, 128)

    # ---- input projection hoisted out of the recurrence: one matmul ----
    # row (t,b) of x is [emb[t,b] | emb[T-1-t,b]]; gate columns are ordered
    # [r_f, r_b, z_f, z_b, n_f, n_b], so gi_all row (t,b) holds the fwd gates
    # for time t and the bwd gates for time T-1-t.
    x = in_ref[0:TB, 0:2 * E]                                              # (TB, 2E)
    gi_all = jnp.dot(x, wih, preferred_element_type=jnp.float32) + bih     # (TB, 6H)

    # pre-slice per-step gate rows and masks: keeps them off the h-dependent chain
    gi_list = [gi_all[i * BP:(i + 1) * BP, :] for i in range(T)]
    m_list = [in_ref[TB + i * BP:TB + (i + 1) * BP, 0:H2] for i in range(T)]

    # ---- fused bidirectional GRU recurrence (fully unrolled, T=8) ----
    # state layout: h = [h_fwd | h_bwd]  (BP, 2H); one (BP,2H)x(2H,6H) matmul/step.
    h = jnp.zeros((BP, H2), jnp.float32)
    step_out = [None] * T
    for i in range(T):
        gi = gi_list[i]                                                     # (BP, 6H)
        gh = jnp.dot(h, whh, preferred_element_type=jnp.float32) + bhh      # (BP, 6H)
        rz = jax.nn.sigmoid(gi[:, :H4] + gh[:, :H4])                        # [r_f r_b z_f z_b]
        r, z = rz[:, :H2], rz[:, H2:]
        n = jnp.tanh(gi[:, H4:] + r * gh[:, H4:])
        h_new = (1.0 - z) * n + z * h
        m = m_list[i]                                                       # (BP, 2H) float mask
        step_out[i] = m * h_new                       # fwd out @ time i | bwd out @ time T-1-i
        h = m * h_new + (1.0 - m) * h                 # packed-sequence semantics

    encoded = h   # (BP, 2H) == hidden.permute(1,0,2).reshape(B,-1) in the torch module

    # ---- assemble per-timestep bi-directional features in vregs (no scratch) ----
    feats = jnp.concatenate(
        [jnp.concatenate([step_out[t][:, 0:H], step_out[T - 1 - t][:, H:H2]], axis=1)
         for t in range(T)], axis=0)                                        # (TB, 2H)
    rows = jnp.concatenate([feats, encoded], axis=0)                        # (TB+BP, 2H)

    # ---- all heads: one fused first-layer matmul + one block-diag second layer,
    #      one lane-dense full-tile output write ----
    hdn = jnp.maximum(jnp.dot(rows, w1, preferred_element_type=jnp.float32) + b1, 0.0)
    scores = jnp.dot(hdn, w2, preferred_element_type=jnp.float32) + b2      # (TB+BP, 128)
    out_ref[...] = jax.nn.sigmoid(scores)


# ---- parameter repacking (torch layout -> one flat kernel buffer) -------------
def pack_params(p):
    def gate(w, g):                      # torch GRU gate order: r, z, n
        return np.asarray(w, np.float32)[g * H:(g + 1) * H, :]

    W = np.zeros((N_ROWS, W_COLS), np.float32)

    # GRU weights, fused fwd/bwd block layout; columns [r_f r_b z_f z_b n_f n_b]
    for g in range(3):
        cf = slice(2 * g * H, (2 * g + 1) * H)         # fwd gate columns
        cb = slice((2 * g + 1) * H, (2 * g + 2) * H)   # bwd gate columns
        W[R_WIH:R_WIH + E, cf] = gate(p['wih_f'], g).T
        W[R_WIH + E:R_WIH + 2 * E, cb] = gate(p['wih_b'], g).T
        W[R_WHH:R_WHH + H, cf] = gate(p['whh_f'], g).T
        W[R_WHH + H:R_WHH + H2, cb] = gate(p['whh_b'], g).T

    def bias_cat(bf, bb):
        bf = np.asarray(bf, np.float32); bb = np.asarray(bb, np.float32)
        return np.concatenate([bf[0:H], bb[0:H], bf[H:2 * H], bb[H:2 * H],
                               bf[2 * H:], bb[2 * H:]])

    W[R_BIH, 0:H6] = bias_cat(p['bih_f'], p['bih_b'])
    W[R_BHH, 0:H6] = bias_cat(p['bhh_f'], p['bhh_b'])

    # fused first layers: columns [nsew_0 | nsew_1 | nsew_2 | nsew_3 | door]
    for k in range(4):
        W[R_W1:R_W1 + H2, k * LH:(k + 1) * LH] = np.asarray(p['nsew_w1'][k]).T
        W[R_B1, k * LH:(k + 1) * LH] = np.asarray(p['nsew_b1'][k])
    W[R_W1:R_W1 + H2, 4 * LH:5 * LH] = np.asarray(p['door_w1']).T
    W[R_B1, 4 * LH:5 * LH] = np.asarray(p['door_b1'])

    # block-diagonal second layers -> lane-dense (5*LH, 128) score projection:
    # output col k (k<4) = nsew head k, output col 4 = door head, cols 5..127 unused
    for k in range(4):
        W[R_W2 + k * LH:R_W2 + (k + 1) * LH, k] = np.asarray(p['nsew_w2'][k])[0]
        W[R_B2, k] = np.asarray(p['nsew_b2'][k])[0]
    W[R_W2 + 4 * LH:R_W2 + 5 * LH, 4] = np.asarray(p['door_w2'])[0]
    W[R_B2, 4] = np.asarray(p['door_b2'])[0]

    return {'embedding': p['embedding'], 'wpack': jnp.asarray(W)}


# ---- wrapper (glue: pad batch, embedding gather, mask, layout, pallas_call) ---
@jax.jit
def navigation_forward(packed, token_ids):
    # pad batch to a full sublane tile; padded rows have length 0 (masked out)
    tok = jnp.zeros((BP, T), jnp.int32).at[:B].set(token_ids)
    emb = packed['embedding'][tok].astype(jnp.float32)                 # (BP, T, E)
    emb_tm = jnp.transpose(emb, (1, 0, 2))                             # (T, BP, E)
    x_flat = jnp.concatenate([emb_tm, emb_tm[::-1]], axis=-1).reshape(TB, 2 * E)

    lengths = jnp.sum((tok != 0).astype(jnp.int32), axis=1)            # (BP,)
    m_f = (jnp.arange(T)[:, None] < lengths[None, :]).astype(jnp.float32)   # (T, BP)
    mask_flat = jnp.concatenate(
        [jnp.broadcast_to(m_f[:, :, None], (T, BP, H)),
         jnp.broadcast_to(m_f[::-1, :, None], (T, BP, H))], axis=-1).reshape(TB, H2)

    # one packed VMEM input: rows 0:TB = x, rows TB:2*TB = mask (cols 0:2H)
    packed_in = jnp.concatenate(
        [x_flat, jnp.pad(mask_flat, ((0, 0), (0, 2 * E - H2)))], axis=0)    # (2*TB, 2E)

    out = pl.pallas_call(
        nav_kernel,
        out_shape=jax.ShapeDtypeStruct((TB + BP, W_COLS), jnp.float32),
        in_specs=[pl.BlockSpec(memory_space=pltpu.MemorySpace.VMEM)] * 2,
        out_specs=pl.BlockSpec(memory_space=pltpu.MemorySpace.VMEM),
    )(packed_in, packed['wpack'])

    door = out[:TB, 4].reshape(T, BP).T[:B]                            # (B, T) batch-first
    nsew = out[TB:TB + B, 0:4]                                         # (B, 4)
    nsew_scores = {k: nsew[:, i:i + 1] for i, k in enumerate(NSEW_DIRS)}
    return door, nsew_scores


# ---- pure-JAX reference (raw torch-layout params, same math) ------------------
def navigation_ref(p, token_ids):
    emb = p['embedding'][token_ids].astype(jnp.float32)                # (B, T, E)
    lengths = jnp.sum((token_ids != 0).astype(jnp.int32), axis=1)

    def cell(x, h, wih, whh, bih, bhh):
        gi = x @ wih.T + bih
        gh = h @ whh.T + bhh
        r = jax.nn.sigmoid(gi[:, :H] + gh[:, :H])
        z = jax.nn.sigmoid(gi[:, H:2 * H] + gh[:, H:2 * H])
        n = jnp.tanh(gi[:, 2 * H:] + r * gh[:, 2 * H:])
        return (1.0 - z) * n + z * h

    def run_dir(wih, whh, bih, bhh, reverse):
        h = jnp.zeros((B, H), jnp.float32)
        outs = jnp.zeros((T, B, H), jnp.float32)
        ts = range(T - 1, -1, -1) if reverse else range(T)
        for t in ts:
            h_new = cell(emb[:, t, :], h, wih, whh, bih, bhh)
            mask = (t < lengths)[:, None]
            outs = outs.at[t].set(jnp.where(mask, h_new, 0.0))
            h = jnp.where(mask, h_new, h)
        return outs, h

    out_f, h_f = run_dir(p['wih_f'], p['whh_f'], p['bih_f'], p['bhh_f'], False)
    out_b, h_b = run_dir(p['wih_b'], p['whh_b'], p['bih_b'], p['bhh_b'], True)
    encoded = jnp.concatenate([h_f, h_b], axis=-1)                     # (B, 2H)

    nsew = []
    for k in range(4):
        hdn = jnp.maximum(encoded @ p['nsew_w1'][k].T + p['nsew_b1'][k], 0.0)
        nsew.append(jax.nn.sigmoid(hdn @ p['nsew_w2'][k].T + p['nsew_b2'][k]))
    nsew = jnp.concatenate(nsew, axis=1)                               # (B, 4)

    out_bt = jnp.concatenate([out_f, out_b], axis=-1).transpose(1, 0, 2)     # (B, T, 2H)
    hdn = jnp.maximum(out_bt @ p['door_w1'].T + p['door_b1'], 0.0)
    door = jax.nn.sigmoid(hdn @ p['door_w2'].T + p['door_b2'])[..., 0]       # (B, T)
    return door, nsew


# ---- deterministic parameter init (PyTorch-like uniform ranges, torch layout) -
def init_params(key):
    ks = jax.random.split(key, 20)
    u = lambda k, shape, s: jax.random.uniform(k, shape, jnp.float32, -s, s)
    s_gru = 1.0 / np.sqrt(H)
    s_l1 = 1.0 / np.sqrt(2 * H)
    s_l2 = 1.0 / np.sqrt(LH)
    p = {}
    p['embedding'] = jax.random.normal(ks[0], (VOCAB, E), jnp.float32) * 0.1
    p['wih_f'] = u(ks[1], (3 * H, E), s_gru)
    p['whh_f'] = u(ks[2], (3 * H, H), s_gru)
    p['bih_f'] = u(ks[3], (3 * H,), s_gru)
    p['bhh_f'] = u(ks[4], (3 * H,), s_gru)
    p['wih_b'] = u(ks[5], (3 * H, E), s_gru)
    p['whh_b'] = u(ks[6], (3 * H, H), s_gru)
    p['bih_b'] = u(ks[7], (3 * H,), s_gru)
    p['bhh_b'] = u(ks[8], (3 * H,), s_gru)
    p['nsew_w1'] = u(ks[9], (4, LH, 2 * H), s_l1)
    p['nsew_b1'] = u(ks[10], (4, LH), s_l1)
    p['nsew_w2'] = u(ks[11], (4, 1, LH), s_l2)
    p['nsew_b2'] = u(ks[12], (4, 1), s_l2)
    p['door_w1'] = u(ks[13], (LH, 2 * H), s_l1)
    p['door_b1'] = u(ks[14], (LH,), s_l1)
    p['door_w2'] = u(ks[15], (1, LH), s_l2)
    p['door_b2'] = u(ks[16], (1,), s_l2)
    return p


if __name__ == "__main__":
    key = jax.random.PRNGKey(0)
    k_param, k_tok = jax.random.split(key)
    raw = init_params(k_param)
    packed = pack_params(raw)

    # synthetic pre-tokenized descriptions: ids in [1, VOCAB), 0 = <PAD> at the end
    token_ids = jax.random.randint(k_tok, (B, T), 1, VOCAB, dtype=jnp.int32)
    token_ids = token_ids.at[1, 5:].set(0)     # second sequence has length 5

    door_scores, nsew_scores = navigation_forward(packed, token_ids)
    jax.block_until_ready(door_scores)
    for v in nsew_scores.values():
        jax.block_until_ready(v)

    # correctness check against the pure-JAX reference
    door_ref, nsew_ref = navigation_ref(raw, token_ids)
    nsew_kernel = jnp.concatenate([nsew_scores[k] for k in NSEW_DIRS], axis=1)
    np.testing.assert_allclose(np.asarray(door_scores), np.asarray(door_ref),
                               atol=2e-3, rtol=2e-3)
    np.testing.assert_allclose(np.asarray(nsew_kernel), np.asarray(nsew_ref),
                               atol=2e-3, rtol=2e-3)

    print("KERNEL_OK")
</pallas_src>

<mosaic_0001>
module attributes {stable_mosaic.version = 11 : i64} {
  func.func @nav_kernel(%arg0: memref<128x64xf32, #tpu.memory_space<vmem>>, %arg1: memref<240x128xf32, #tpu.memory_space<vmem>>, %arg2: memref<72x128xf32, #tpu.memory_space<vmem>>) attributes {dimension_semantics = [], scalar_prefetch = 0 : i64, scratch_operands = 0 : i64, tpu.core_type = #tpu.core_type<tc>} {
    %c0 = arith.constant 0 : index
    %c0_0 = arith.constant 0 : index
    %0 = vector.load %arg1[%c0, %c0_0] : memref<240x128xf32, #tpu.memory_space<vmem>>, vector<64x96xf32>
    %c64 = arith.constant 64 : index
    %c0_1 = arith.constant 0 : index
    %1 = vector.load %arg1[%c64, %c0_1] : memref<240x128xf32, #tpu.memory_space<vmem>>, vector<32x96xf32>
    %c96 = arith.constant 96 : index
    %c0_2 = arith.constant 0 : index
    %2 = vector.load %arg1[%c96, %c0_2] : memref<240x128xf32, #tpu.memory_space<vmem>>, vector<1x96xf32>
    %c104 = arith.constant 104 : index
    %c0_3 = arith.constant 0 : index
    %3 = vector.load %arg1[%c104, %c0_3] : memref<240x128xf32, #tpu.memory_space<vmem>>, vector<1x96xf32>
    %c112 = arith.constant 112 : index
    %c0_4 = arith.constant 0 : index
    %4 = vector.load %arg1[%c112, %c0_4] : memref<240x128xf32, #tpu.memory_space<vmem>>, vector<32x80xf32>
    %c144 = arith.constant 144 : index
    %c0_5 = arith.constant 0 : index
    %5 = vector.load %arg1[%c144, %c0_5] : memref<240x128xf32, #tpu.memory_space<vmem>>, vector<1x80xf32>
    %c152 = arith.constant 152 : index
    %c0_6 = arith.constant 0 : index
    %6 = vector.load %arg1[%c152, %c0_6] : memref<240x128xf32, #tpu.memory_space<vmem>>, vector<80x128xf32>
    %c232 = arith.constant 232 : index
    %c0_7 = arith.constant 0 : index
    %7 = vector.load %arg1[%c232, %c0_7] : memref<240x128xf32, #tpu.memory_space<vmem>>, vector<1x128xf32>
    %c0_8 = arith.constant 0 : index
    %c0_9 = arith.constant 0 : index
    %8 = vector.load %arg0[%c0_8, %c0_9] : memref<128x64xf32, #tpu.memory_space<vmem>>, vector<64x64xf32>
    %cst = arith.constant dense<0.000000e+00> : vector<64x96xf32>
    %9 = tpu.matmul %8, %0, %cst {dimension_numbers = #tpu.dot_dimension_numbers<[1], [0], [0], [1], [0, 0, 1, 1], [], []>} : vector<64x64xf32>, vector<64x96xf32>, vector<64x96xf32> -> vector<64x96xf32>
    %10 = vector.broadcast %2 : vector<1x96xf32> to vector<64x96xf32>
    %11 = arith.addf %9, %10 : vector<64x96xf32>
    %12 = vector.extract_strided_slice %11 {offsets = [0, 0], sizes = [8, 96], strides = [1, 1]} : vector<64x96xf32> to vector<8x96xf32>
    %13 = vector.extract_strided_slice %11 {offsets = [8, 0], sizes = [8, 96], strides = [1, 1]} : vector<64x96xf32> to vector<8x96xf32>
    %14 = vector.extract_strided_slice %11 {offsets = [16, 0], sizes = [8, 96], strides = [1, 1]} : vector<64x96xf32> to vector<8x96xf32>
    %15 = vector.extract_strided_slice %11 {offsets = [24, 0], sizes = [8, 96], strides = [1, 1]} : vector<64x96xf32> to vector<8x96xf32>
    %16 = vector.extract_strided_slice %11 {offsets = [32, 0], sizes = [8, 96], strides = [1, 1]} : vector<64x96xf32> to vector<8x96xf32>
    %17 = vector.extract_strided_slice %11 {offsets = [40, 0], sizes = [8, 96], strides = [1, 1]} : vector<64x96xf32> to vector<8x96xf32>
    %18 = vector.extract_strided_slice %11 {offsets = [48, 0], sizes = [8, 96], strides = [1, 1]} : vector<64x96xf32> to vector<8x96xf32>
    %19 = vector.extract_strided_slice %11 {offsets = [56, 0], sizes = [8, 96], strides = [1, 1]} : vector<64x96xf32> to vector<8x96xf32>
    %c64_10 = arith.constant 64 : index
    %c0_11 = arith.constant 0 : index
    %20 = vector.load %arg0[%c64_10, %c0_11] : memref<128x64xf32, #tpu.memory_space<vmem>>, vector<8x32xf32>
    %c72 = arith.constant 72 : index
    %c0_12 = arith.constant 0 : index
    %21 = vector.load %arg0[%c72, %c0_12] : memref<128x64xf32, #tpu.memory_space<vmem>>, vector<8x32xf32>
    %c80 = arith.constant 80 : index
    %c0_13 = arith.constant 0 : index
    %22 = vector.load %arg0[%c80, %c0_13] : memref<128x64xf32, #tpu.memory_space<vmem>>, vector<8x32xf32>
    %c88 = arith.constant 88 : index
    %c0_14 = arith.constant 0 : index
    %23 = vector.load %arg0[%c88, %c0_14] : memref<128x64xf32, #tpu.memory_space<vmem>>, vector<8x32xf32>
    %c96_15 = arith.constant 96 : index
    %c0_16 = arith.constant 0 : index
    %24 = vector.load %arg0[%c96_15, %c0_16] : memref<128x64xf32, #tpu.memory_space<vmem>>, vector<8x32xf32>
    %c104_17 = arith.constant 104 : index
    %c0_18 = arith.constant 0 : index
    %25 = vector.load %arg0[%c104_17, %c0_18] : memref<128x64xf32, #tpu.memory_space<vmem>>, vector<8x32xf32>
    %c112_19 = arith.constant 112 : index
    %c0_20 = arith.constant 0 : index
    %26 = vector.load %arg0[%c112_19, %c0_20] : memref<128x64xf32, #tpu.memory_space<vmem>>, vector<8x32xf32>
    %c120 = arith.constant 120 : index
    %c0_21 = arith.constant 0 : index
    %27 = vector.load %arg0[%c120, %c0_21] : memref<128x64xf32, #tpu.memory_space<vmem>>, vector<8x32xf32>
    %cst_22 = arith.constant 0.000000e+00 : f32
    %28 = vector.broadcast %cst_22 : f32 to vector<8x32xf32>
    %cst_23 = arith.constant dense<0.000000e+00> : vector<8x96xf32>
    %29 = tpu.matmul %28, %1, %cst_23 {dimension_numbers = #tpu.dot_dimension_numbers<[1], [0], [0], [1], [0, 0, 1, 1], [], []>} : vector<8x32xf32>, vector<32x96xf32>, vector<8x96xf32> -> vector<8x96xf32>
    %30 = vector.broadcast %3 : vector<1x96xf32> to vector<8x96xf32>
    %31 = arith.addf %29, %30 : vector<8x96xf32>
    %32 = vector.extract_strided_slice %12 {offsets = [0, 0], sizes = [8, 64], strides = [1, 1]} : vector<8x96xf32> to vector<8x64xf32>
    %33 = vector.extract_strided_slice %31 {offsets = [0, 0], sizes = [8, 64], strides = [1, 1]} : vector<8x96xf32> to vector<8x64xf32>
    %34 = arith.addf %32, %33 : vector<8x64xf32>
    %35 = arith.negf %34 : vector<8x64xf32>
    %36 = math.exp %35 : vector<8x64xf32>
    %cst_24 = arith.constant 1.000000e+00 : f32
    %37 = vector.broadcast %cst_24 : f32 to vector<8x64xf32>
    %38 = arith.addf %37, %36 : vector<8x64xf32>
    %39 = arith.divf %37, %38 : vector<8x64xf32>
    %40 = vector.extract_strided_slice %39 {offsets = [0, 0], sizes = [8, 32], strides = [1, 1]} : vector<8x64xf32> to vector<8x32xf32>
    %41 = vector.extract_strided_slice %39 {offsets = [0, 32], sizes = [8, 32], strides = [1, 1]} : vector<8x64xf32> to vector<8x32xf32>
    %42 = vector.extract_strided_slice %12 {offsets = [0, 64], sizes = [8, 32], strides = [1, 1]} : vector<8x96xf32> to vector<8x32xf32>
    %43 = vector.extract_strided_slice %31 {offsets = [0, 64], sizes = [8, 32], strides = [1, 1]} : vector<8x96xf32> to vector<8x32xf32>
    %44 = arith.mulf %40, %43 : vector<8x32xf32>
    %45 = arith.addf %42, %44 : vector<8x32xf32>
    %46 = math.tanh %45 : vector<8x32xf32>
    %cst_25 = arith.constant 1.000000e+00 : f32
    %47 = vector.broadcast %cst_25 : f32 to vector<8x32xf32>
    %48 = arith.subf %47, %41 : vector<8x32xf32>
    %49 = arith.mulf %48, %46 : vector<8x32xf32>
    %50 = arith.mulf %41, %28 : vector<8x32xf32>
    %51 = arith.addf %49, %50 : vector<8x32xf32>
    %52 = arith.mulf %20, %51 : vector<8x32xf32>
    %53 = arith.mulf %20, %51 : vector<8x32xf32>
    %cst_26 = arith.constant 1.000000e+00 : f32
    %54 = vector.broadcast %cst_26 : f32 to vector<8x32xf32>
    %55 = arith.subf %54, %20 : vector<8x32xf32>
    %56 = arith.mulf %55, %28 : vector<8x32xf32>
    %57 = arith.addf %53, %56 : vector<8x32xf32>
    %cst_27 = arith.constant dense<0.000000e+00> : vector<8x96xf32>
    %58 = tpu.matmul %57, %1, %cst_27 {dimension_numbers = #tpu.dot_dimension_numbers<[1], [0], [0], [1], [0, 0, 1, 1], [], []>} : vector<8x32xf32>, vector<32x96xf32>, vector<8x96xf32> -> vector<8x96xf32>
    %59 = vector.broadcast %3 : vector<1x96xf32> to vector<8x96xf32>
    %60 = arith.addf %58, %59 : vector<8x96xf32>
    %61 = vector.extract_strided_slice %13 {offsets = [0, 0], sizes = [8, 64], strides = [1, 1]} : vector<8x96xf32> to vector<8x64xf32>
    %62 = vector.extract_strided_slice %60 {offsets = [0, 0], sizes = [8, 64], strides = [1, 1]} : vector<8x96xf32> to vector<8x64xf32>
    %63 = arith.addf %61, %62 : vector<8x64xf32>
    %64 = arith.negf %63 : vector<8x64xf32>
    %65 = math.exp %64 : vector<8x64xf32>
    %cst_28 = arith.constant 1.000000e+00 : f32
    %66 = vector.broadcast %cst_28 : f32 to vector<8x64xf32>
    %67 = arith.addf %66, %65 : vector<8x64xf32>
    %68 = arith.divf %66, %67 : vector<8x64xf32>
    %69 = vector.extract_strided_slice %68 {offsets = [0, 0], sizes = [8, 32], strides = [1, 1]} : vector<8x64xf32> to vector<8x32xf32>
    %70 = vector.extract_strided_slice %68 {offsets = [0, 32], sizes = [8, 32], strides = [1, 1]} : vector<8x64xf32> to vector<8x32xf32>
    %71 = vector.extract_strided_slice %13 {offsets = [0, 64], sizes = [8, 32], strides = [1, 1]} : vector<8x96xf32> to vector<8x32xf32>
    %72 = vector.extract_strided_slice %60 {offsets = [0, 64], sizes = [8, 32], strides = [1, 1]} : vector<8x96xf32> to vector<8x32xf32>
    %73 = arith.mulf %69, %72 : vector<8x32xf32>
    %74 = arith.addf %71, %73 : vector<8x32xf32>
    %75 = math.tanh %74 : vector<8x32xf32>
    %cst_29 = arith.constant 1.000000e+00 : f32
    %76 = vector.broadcast %cst_29 : f32 to vector<8x32xf32>
    %77 = arith.subf %76, %70 : vector<8x32xf32>
    %78 = arith.mulf %77, %75 : vector<8x32xf32>
    %79 = arith.mulf %70, %57 : vector<8x32xf32>
    %80 = arith.addf %78, %79 : vector<8x32xf32>
    %81 = arith.mulf %21, %80 : vector<8x32xf32>
    %82 = arith.mulf %21, %80 : vector<8x32xf32>
    %cst_30 = arith.constant 1.000000e+00 : f32
    %83 = vector.broadcast %cst_30 : f32 to vector<8x32xf32>
    %84 = arith.subf %83, %21 : vector<8x32xf32>
    %85 = arith.mulf %84, %57 : vector<8x32xf32>
    %86 = arith.addf %82, %85 : vector<8x32xf32>
    %cst_31 = arith.constant dense<0.000000e+00> : vector<8x96xf32>
    %87 = tpu.matmul %86, %1, %cst_31 {dimension_numbers = #tpu.dot_dimension_numbers<[1], [0], [0], [1], [0, 0, 1, 1], [], []>} : vector<8x32xf32>, vector<32x96xf32>, vector<8x96xf32> -> vector<8x96xf32>
    %88 = vector.broadcast %3 : vector<1x96xf32> to vector<8x96xf32>
    %89 = arith.addf %87, %88 : vector<8x96xf32>
    %90 = vector.extract_strided_slice %14 {offsets = [0, 0], sizes = [8, 64], strides = [1, 1]} : vector<8x96xf32> to vector<8x64xf32>
    %91 = vector.extract_strided_slice %89 {offsets = [0, 0], sizes = [8, 64], strides = [1, 1]} : vector<8x96xf32> to vector<8x64xf32>
    %92 = arith.addf %90, %91 : vector<8x64xf32>
    %93 = arith.negf %92 : vector<8x64xf32>
    %94 = math.exp %93 : vector<8x64xf32>
    %cst_32 = arith.constant 1.000000e+00 : f32
    %95 = vector.broadcast %cst_32 : f32 to vector<8x64xf32>
    %96 = arith.addf %95, %94 : vector<8x64xf32>
    %97 = arith.divf %95, %96 : vector<8x64xf32>
    %98 = vector.extract_strided_slice %97 {offsets = [0, 0], sizes = [8, 32], strides = [1, 1]} : vector<8x64xf32> to vector<8x32xf32>
    %99 = vector.extract_strided_slice %97 {offsets = [0, 32], sizes = [8, 32], strides = [1, 1]} : vector<8x64xf32> to vector<8x32xf32>
    %100 = vector.extract_strided_slice %14 {offsets = [0, 64], sizes = [8, 32], strides = [1, 1]} : vector<8x96xf32> to vector<8x32xf32>
    %101 = vector.extract_strided_slice %89 {offsets = [0, 64], sizes = [8, 32], strides = [1, 1]} : vector<8x96xf32> to vector<8x32xf32>
    %102 = arith.mulf %98, %101 : vector<8x32xf32>
    %103 = arith.addf %100, %102 : vector<8x32xf32>
    %104 = math.tanh %103 : vector<8x32xf32>
    %cst_33 = arith.constant 1.000000e+00 : f32
    %105 = vector.broadcast %cst_33 : f32 to vector<8x32xf32>
    %106 = arith.subf %105, %99 : vector<8x32xf32>
    %107 = arith.mulf %106, %104 : vector<8x32xf32>
    %108 = arith.mulf %99, %86 : vector<8x32xf32>
    %109 = arith.addf %107, %108 : vector<8x32xf32>
    %110 = arith.mulf %22, %109 : vector<8x32xf32>
    %111 = arith.mulf %22, %109 : vector<8x32xf32>
    %cst_34 = arith.constant 1.000000e+00 : f32
    %112 = vector.broadcast %cst_34 : f32 to vector<8x32xf32>
    %113 = arith.subf %112, %22 : vector<8x32xf32>
    %114 = arith.mulf %113, %86 : vector<8x32xf32>
    %115 = arith.addf %111, %114 : vector<8x32xf32>
    %cst_35 = arith.constant dense<0.000000e+00> : vector<8x96xf32>
    %116 = tpu.matmul %115, %1, %cst_35 {dimension_numbers = #tpu.dot_dimension_numbers<[1], [0], [0], [1], [0, 0, 1, 1], [], []>} : vector<8x32xf32>, vector<32x96xf32>, vector<8x96xf32> -> vector<8x96xf32>
    %117 = vector.broadcast %3 : vector<1x96xf32> to vector<8x96xf32>
    %118 = arith.addf %116, %117 : vector<8x96xf32>
    %119 = vector.extract_strided_slice %15 {offsets = [0, 0], sizes = [8, 64], strides = [1, 1]} : vector<8x96xf32> to vector<8x64xf32>
    %120 = vector.extract_strided_slice %118 {offsets = [0, 0], sizes = [8, 64], strides = [1, 1]} : vector<8x96xf32> to vector<8x64xf32>
    %121 = arith.addf %119, %120 : vector<8x64xf32>
    %122 = arith.negf %121 : vector<8x64xf32>
    %123 = math.exp %122 : vector<8x64xf32>
    %cst_36 = arith.constant 1.000000e+00 : f32
    %124 = vector.broadcast %cst_36 : f32 to vector<8x64xf32>
    %125 = arith.addf %124, %123 : vector<8x64xf32>
    %126 = arith.divf %124, %125 : vector<8x64xf32>
    %127 = vector.extract_strided_slice %126 {offsets = [0, 0], sizes = [8, 32], strides = [1, 1]} : vector<8x64xf32> to vector<8x32xf32>
    %128 = vector.extract_strided_slice %126 {offsets = [0, 32], sizes = [8, 32], strides = [1, 1]} : vector<8x64xf32> to vector<8x32xf32>
    %129 = vector.extract_strided_slice %15 {offsets = [0, 64], sizes = [8, 32], strides = [1, 1]} : vector<8x96xf32> to vector<8x32xf32>
    %130 = vector.extract_strided_slice %118 {offsets = [0, 64], sizes = [8, 32], strides = [1, 1]} : vector<8x96xf32> to vector<8x32xf32>
    %131 = arith.mulf %127, %130 : vector<8x32xf32>
    %132 = arith.addf %129, %131 : vector<8x32xf32>
    %133 = math.tanh %132 : vector<8x32xf32>
    %cst_37 = arith.constant 1.000000e+00 : f32
    %134 = vector.broadcast %cst_37 : f32 to vector<8x32xf32>
    %135 = arith.subf %134, %128 : vector<8x32xf32>
    %136 = arith.mulf %135, %133 : vector<8x32xf32>
    %137 = arith.mulf %128, %115 : vector<8x32xf32>
    %138 = arith.addf %136, %137 : vector<8x32xf32>
    %139 = arith.mulf %23, %138 : vector<8x32xf32>
    %140 = arith.mulf %23, %138 : vector<8x32xf32>
    %cst_38 = arith.constant 1.000000e+00 : f32
    %141 = vector.broadcast %cst_38 : f32 to vector<8x32xf32>
    %142 = arith.subf %141, %23 : vector<8x32xf32>
    %143 = arith.mulf %142, %115 : vector<8x32xf32>
    %144 = arith.addf %140, %143 : vector<8x32xf32>
    %cst_39 = arith.constant dense<0.000000e+00> : vector<8x96xf32>
    %145 = tpu.matmul %144, %1, %cst_39 {dimension_numbers = #tpu.dot_dimension_numbers<[1], [0], [0], [1], [0, 0, 1, 1], [], []>} : vector<8x32xf32>, vector<32x96xf32>, vector<8x96xf32> -> vector<8x96xf32>
    %146 = vector.broadcast %3 : vector<1x96xf32> to vector<8x96xf32>
    %147 = arith.addf %145, %146 : vector<8x96xf32>
    %148 = vector.extract_strided_slice %16 {offsets = [0, 0], sizes = [8, 64], strides = [1, 1]} : vector<8x96xf32> to vector<8x64xf32>
    %149 = vector.extract_strided_slice %147 {offsets = [0, 0], sizes = [8, 64], strides = [1, 1]} : vector<8x96xf32> to vector<8x64xf32>
    %150 = arith.addf %148, %149 : vector<8x64xf32>
    %151 = arith.negf %150 : vector<8x64xf32>
    %152 = math.exp %151 : vector<8x64xf32>
    %cst_40 = arith.constant 1.000000e+00 : f32
    %153 = vector.broadcast %cst_40 : f32 to vector<8x64xf32>
    %154 = arith.addf %153, %152 : vector<8x64xf32>
    %155 = arith.divf %153, %154 : vector<8x64xf32>
    %156 = vector.extract_strided_slice %155 {offsets = [0, 0], sizes = [8, 32], strides = [1, 1]} : vector<8x64xf32> to vector<8x32xf32>
    %157 = vector.extract_strided_slice %155 {offsets = [0, 32], sizes = [8, 32], strides = [1, 1]} : vector<8x64xf32> to vector<8x32xf32>
    %158 = vector.extract_strided_slice %16 {offsets = [0, 64], sizes = [8, 32], strides = [1, 1]} : vector<8x96xf32> to vector<8x32xf32>
    %159 = vector.extract_strided_slice %147 {offsets = [0, 64], sizes = [8, 32], strides = [1, 1]} : vector<8x96xf32> to vector<8x32xf32>
    %160 = arith.mulf %156, %159 : vector<8x32xf32>
    %161 = arith.addf %158, %160 : vector<8x32xf32>
    %162 = math.tanh %161 : vector<8x32xf32>
    %cst_41 = arith.constant 1.000000e+00 : f32
    %163 = vector.broadcast %cst_41 : f32 to vector<8x32xf32>
    %164 = arith.subf %163, %157 : vector<8x32xf32>
    %165 = arith.mulf %164, %162 : vector<8x32xf32>
    %166 = arith.mulf %157, %144 : vector<8x32xf32>
    %167 = arith.addf %165, %166 : vector<8x32xf32>
    %168 = arith.mulf %24, %167 : vector<8x32xf32>
    %169 = arith.mulf %24, %167 : vector<8x32xf32>
    %cst_42 = arith.constant 1.000000e+00 : f32
    %170 = vector.broadcast %cst_42 : f32 to vector<8x32xf32>
    %171 = arith.subf %170, %24 : vector<8x32xf32>
    %172 = arith.mulf %171, %144 : vector<8x32xf32>
    %173 = arith.addf %169, %172 : vector<8x32xf32>
    %cst_43 = arith.constant dense<0.000000e+00> : vector<8x96xf32>
    %174 = tpu.matmul %173, %1, %cst_43 {dimension_numbers = #tpu.dot_dimension_numbers<[1], [0], [0], [1], [0, 0, 1, 1], [], []>} : vector<8x32xf32>, vector<32x96xf32>, vector<8x96xf32> -> vector<8x96xf32>
    %175 = vector.broadcast %3 : vector<1x96xf32> to vector<8x96xf32>
    %176 = arith.addf %174, %175 : vector<8x96xf32>
    %177 = vector.extract_strided_slice %17 {offsets = [0, 0], sizes = [8, 64], strides = [1, 1]} : vector<8x96xf32> to vector<8x64xf32>
    %178 = vector.extract_strided_slice %176 {offsets = [0, 0], sizes = [8, 64], strides = [1, 1]} : vector<8x96xf32> to vector<8x64xf32>
    %179 = arith.addf %177, %178 : vector<8x64xf32>
    %180 = arith.negf %179 : vector<8x64xf32>
    %181 = math.exp %180 : vector<8x64xf32>
    %cst_44 = arith.constant 1.000000e+00 : f32
    %182 = vector.broadcast %cst_44 : f32 to vector<8x64xf32>
    %183 = arith.addf %182, %181 : vector<8x64xf32>
    %184 = arith.divf %182, %183 : vector<8x64xf32>
    %185 = vector.extract_strided_slice %184 {offsets = [0, 0], sizes = [8, 32], strides = [1, 1]} : vector<8x64xf32> to vector<8x32xf32>
    %186 = vector.extract_strided_slice %184 {offsets = [0, 32], sizes = [8, 32], strides = [1, 1]} : vector<8x64xf32> to vector<8x32xf32>
    %187 = vector.extract_strided_slice %17 {offsets = [0, 64], sizes = [8, 32], strides = [1, 1]} : vector<8x96xf32> to vector<8x32xf32>
    %188 = vector.extract_strided_slice %176 {offsets = [0, 64], sizes = [8, 32], strides = [1, 1]} : vector<8x96xf32> to vector<8x32xf32>
    %189 = arith.mulf %185, %188 : vector<8x32xf32>
    %190 = arith.addf %187, %189 : vector<8x32xf32>
    %191 = math.tanh %190 : vector<8x32xf32>
    %cst_45 = arith.constant 1.000000e+00 : f32
    %192 = vector.broadcast %cst_45 : f32 to vector<8x32xf32>
    %193 = arith.subf %192, %186 : vector<8x32xf32>
    %194 = arith.mulf %193, %191 : vector<8x32xf32>
    %195 = arith.mulf %186, %173 : vector<8x32xf32>
    %196 = arith.addf %194, %195 : vector<8x32xf32>
    %197 = arith.mulf %25, %196 : vector<8x32xf32>
    %198 = arith.mulf %25, %196 : vector<8x32xf32>
    %cst_46 = arith.constant 1.000000e+00 : f32
    %199 = vector.broadcast %cst_46 : f32 to vector<8x32xf32>
    %200 = arith.subf %199, %25 : vector<8x32xf32>
    %201 = arith.mulf %200, %173 : vector<8x32xf32>
    %202 = arith.addf %198, %201 : vector<8x32xf32>
    %cst_47 = arith.constant dense<0.000000e+00> : vector<8x96xf32>
    %203 = tpu.matmul %202, %1, %cst_47 {dimension_numbers = #tpu.dot_dimension_numbers<[1], [0], [0], [1], [0, 0, 1, 1], [], []>} : vector<8x32xf32>, vector<32x96xf32>, vector<8x96xf32> -> vector<8x96xf32>
    %204 = vector.broadcast %3 : vector<1x96xf32> to vector<8x96xf32>
    %205 = arith.addf %203, %204 : vector<8x96xf32>
    %206 = vector.extract_strided_slice %18 {offsets = [0, 0], sizes = [8, 64], strides = [1, 1]} : vector<8x96xf32> to vector<8x64xf32>
    %207 = vector.extract_strided_slice %205 {offsets = [0, 0], sizes = [8, 64], strides = [1, 1]} : vector<8x96xf32> to vector<8x64xf32>
    %208 = arith.addf %206, %207 : vector<8x64xf32>
    %209 = arith.negf %208 : vector<8x64xf32>
    %210 = math.exp %209 : vector<8x64xf32>
    %cst_48 = arith.constant 1.000000e+00 : f32
    %211 = vector.broadcast %cst_48 : f32 to vector<8x64xf32>
    %212 = arith.addf %211, %210 : vector<8x64xf32>
    %213 = arith.divf %211, %212 : vector<8x64xf32>
    %214 = vector.extract_strided_slice %213 {offsets = [0, 0], sizes = [8, 32], strides = [1, 1]} : vector<8x64xf32> to vector<8x32xf32>
    %215 = vector.extract_strided_slice %213 {offsets = [0, 32], sizes = [8, 32], strides = [1, 1]} : vector<8x64xf32> to vector<8x32xf32>
    %216 = vector.extract_strided_slice %18 {offsets = [0, 64], sizes = [8, 32], strides = [1, 1]} : vector<8x96xf32> to vector<8x32xf32>
    %217 = vector.extract_strided_slice %205 {offsets = [0, 64], sizes = [8, 32], strides = [1, 1]} : vector<8x96xf32> to vector<8x32xf32>
    %218 = arith.mulf %214, %217 : vector<8x32xf32>
    %219 = arith.addf %216, %218 : vector<8x32xf32>
    %220 = math.tanh %219 : vector<8x32xf32>
    %cst_49 = arith.constant 1.000000e+00 : f32
    %221 = vector.broadcast %cst_49 : f32 to vector<8x32xf32>
    %222 = arith.subf %221, %215 : vector<8x32xf32>
    %223 = arith.mulf %222, %220 : vector<8x32xf32>
    %224 = arith.mulf %215, %202 : vector<8x32xf32>
    %225 = arith.addf %223, %224 : vector<8x32xf32>
    %226 = arith.mulf %26, %225 : vector<8x32xf32>
    %227 = arith.mulf %26, %225 : vector<8x32xf32>
    %cst_50 = arith.constant 1.000000e+00 : f32
    %228 = vector.broadcast %cst_50 : f32 to vector<8x32xf32>
    %229 = arith.subf %228, %26 : vector<8x32xf32>
    %230 = arith.mulf %229, %202 : vector<8x32xf32>
    %231 = arith.addf %227, %230 : vector<8x32xf32>
    %cst_51 = arith.constant dense<0.000000e+00> : vector<8x96xf32>
    %232 = tpu.matmul %231, %1, %cst_51 {dimension_numbers = #tpu.dot_dimension_numbers<[1], [0], [0], [1], [0, 0, 1, 1], [], []>} : vector<8x32xf32>, vector<32x96xf32>, vector<8x96xf32> -> vector<8x96xf32>
    %233 = vector.broadcast %3 : vector<1x96xf32> to vector<8x96xf32>
    %234 = arith.addf %232, %233 : vector<8x96xf32>
    %235 = vector.extract_strided_slice %19 {offsets = [0, 0], sizes = [8, 64], strides = [1, 1]} : vector<8x96xf32> to vector<8x64xf32>
    %236 = vector.extract_strided_slice %234 {offsets = [0, 0], sizes = [8, 64], strides = [1, 1]} : vector<8x96xf32> to vector<8x64xf32>
    %237 = arith.addf %235, %236 : vector<8x64xf32>
    %238 = arith.negf %237 : vector<8x64xf32>
    %239 = math.exp %238 : vector<8x64xf32>
    %cst_52 = arith.constant 1.000000e+00 : f32
    %240 = vector.broadcast %cst_52 : f32 to vector<8x64xf32>
    %241 = arith.addf %240, %239 : vector<8x64xf32>
    %242 = arith.divf %240, %241 : vector<8x64xf32>
    %243 = vector.extract_strided_slice %242 {offsets = [0, 0], sizes = [8, 32], strides = [1, 1]} : vector<8x64xf32> to vector<8x32xf32>
    %244 = vector.extract_strided_slice %242 {offsets = [0, 32], sizes = [8, 32], strides = [1, 1]} : vector<8x64xf32> to vector<8x32xf32>
    %245 = vector.extract_strided_slice %19 {offsets = [0, 64], sizes = [8, 32], strides = [1, 1]} : vector<8x96xf32> to vector<8x32xf32>
    %246 = vector.extract_strided_slice %234 {offsets = [0, 64], sizes = [8, 32], strides = [1, 1]} : vector<8x96xf32> to vector<8x32xf32>
    %247 = arith.mulf %243, %246 : vector<8x32xf32>
    %248 = arith.addf %245, %247 : vector<8x32xf32>
    %249 = math.tanh %248 : vector<8x32xf32>
    %cst_53 = arith.constant 1.000000e+00 : f32
    %250 = vector.broadcast %cst_53 : f32 to vector<8x32xf32>
    %251 = arith.subf %250, %244 : vector<8x32xf32>
    %252 = arith.mulf %251, %249 : vector<8x32xf32>
    %253 = arith.mulf %244, %231 : vector<8x32xf32>
    %254 = arith.addf %252, %253 : vector<8x32xf32>
    %255 = arith.mulf %27, %254 : vector<8x32xf32>
    %256 = arith.mulf %27, %254 : vector<8x32xf32>
    %cst_54 = arith.constant 1.000000e+00 : f32
    %257 = vector.broadcast %cst_54 : f32 to vector<8x32xf32>
    %258 = arith.subf %257, %27 : vector<8x32xf32>
    %259 = arith.mulf %258, %231 : vector<8x32xf32>
    %260 = arith.addf %256, %259 : vector<8x32xf32>
    %261 = vector.extract_strided_slice %52 {offsets = [0, 0], sizes = [8, 16], strides = [1, 1]} : vector<8x32xf32> to vector<8x16xf32>
    %262 = vector.extract_strided_slice %255 {offsets = [0, 16], sizes = [8, 16], strides = [1, 1]} : vector<8x32xf32> to vector<8x16xf32>
    %263 = tpu.concatenate %261, %262 in 1 : vector<8x16xf32>, vector<8x16xf32> -> vector<8x32xf32>
    %264 = vector.extract_strided_slice %81 {offsets = [0, 0], sizes = [8, 16], strides = [1, 1]} : vector<8x32xf32> to vector<8x16xf32>
    %265 = vector.extract_strided_slice %226 {offsets = [0, 16], sizes = [8, 16], strides = [1, 1]} : vector<8x32xf32> to vector<8x16xf32>
    %266 = tpu.concatenate %264, %265 in 1 : vector<8x16xf32>, vector<8x16xf32> -> vector<8x32xf32>
    %267 = vector.extract_strided_slice %110 {offsets = [0, 0], sizes = [8, 16], strides = [1, 1]} : vector<8x32xf32> to vector<8x16xf32>
    %268 = vector.extract_strided_slice %197 {offsets = [0, 16], sizes = [8, 16], strides = [1, 1]} : vector<8x32xf32> to vector<8x16xf32>
    %269 = tpu.concatenate %267, %268 in 1 : vector<8x16xf32>, vector<8x16xf32> -> vector<8x32xf32>
    %270 = vector.extract_strided_slice %139 {offsets = [0, 0], sizes = [8, 16], strides = [1, 1]} : vector<8x32xf32> to vector<8x16xf32>
    %271 = vector.extract_strided_slice %168 {offsets = [0, 16], sizes = [8, 16], strides = [1, 1]} : vector<8x32xf32> to vector<8x16xf32>
    %272 = tpu.concatenate %270, %271 in 1 : vector<8x16xf32>, vector<8x16xf32> -> vector<8x32xf32>
    %273 = vector.extract_strided_slice %168 {offsets = [0, 0], sizes = [8, 16], strides = [1, 1]} : vector<8x32xf32> to vector<8x16xf32>
    %274 = vector.extract_strided_slice %139 {offsets = [0, 16], sizes = [8, 16], strides = [1, 1]} : vector<8x32xf32> to vector<8x16xf32>
    %275 = tpu.concatenate %273, %274 in 1 : vector<8x16xf32>, vector<8x16xf32> -> vector<8x32xf32>
    %276 = vector.extract_strided_slice %197 {offsets = [0, 0], sizes = [8, 16], strides = [1, 1]} : vector<8x32xf32> to vector<8x16xf32>
    %277 = vector.extract_strided_slice %110 {offsets = [0, 16], sizes = [8, 16], strides = [1, 1]} : vector<8x32xf32> to vector<8x16xf32>
    %278 = tpu.concatenate %276, %277 in 1 : vector<8x16xf32>, vector<8x16xf32> -> vector<8x32xf32>
    %279 = vector.extract_strided_slice %226 {offsets = [0, 0], sizes = [8, 16], strides = [1, 1]} : vector<8x32xf32> to vector<8x16xf32>
    %280 = vector.extract_strided_slice %81 {offsets = [0, 16], sizes = [8, 16], strides = [1, 1]} : vector<8x32xf32> to vector<8x16xf32>
    %281 = tpu.concatenate %279, %280 in 1 : vector<8x16xf32>, vector<8x16xf32> -> vector<8x32xf32>
    %282 = vector.extract_strided_slice %255 {offsets = [0, 0], sizes = [8, 16], strides = [1, 1]} : vector<8x32xf32> to vector<8x16xf32>
    %283 = vector.extract_strided_slice %52 {offsets = [0, 16], sizes = [8, 16], strides = [1, 1]} : vector<8x32xf32> to vector<8x16xf32>
    %284 = tpu.concatenate %282, %283 in 1 : vector<8x16xf32>, vector<8x16xf32> -> vector<8x32xf32>
    %285 = tpu.concatenate %263, %266, %269, %272, %275, %278, %281, %284 in 0 : vector<8x32xf32>, vector<8x32xf32>, vector<8x32xf32>, vector<8x32xf32>, vector<8x32xf32>, vector<8x32xf32>, vector<8x32xf32>, vector<8x32xf32> -> vector<64x32xf32>
    %286 = tpu.concatenate %285, %260 in 0 : vector<64x32xf32>, vector<8x32xf32> -> vector<72x32xf32>
    %cst_55 = arith.constant dense<0.000000e+00> : vector<72x80xf32>
    %287 = tpu.matmul %286, %4, %cst_55 {dimension_numbers = #tpu.dot_dimension_numbers<[1], [0], [0], [1], [0, 0, 1, 1], [], []>} : vector<72x32xf32>, vector<32x80xf32>, vector<72x80xf32> -> vector<72x80xf32>
    %288 = vector.broadcast %5 : vector<1x80xf32> to vector<72x80xf32>
    %289 = arith.addf %287, %288 : vector<72x80xf32>
    %cst_56 = arith.constant 0.000000e+00 : f32
    %290 = vector.broadcast %cst_56 : f32 to vector<72x80xf32>
    %291 = arith.maximumf %289, %290 : vector<72x80xf32>
    %cst_57 = arith.constant dense<0.000000e+00> : vector<72x128xf32>
    %292 = tpu.matmul %291, %6, %cst_57 {dimension_numbers = #tpu.dot_dimension_numbers<[1], [0], [0], [1], [0, 0, 1, 1], [], []>} : vector<72x80xf32>, vector<80x128xf32>, vector<72x128xf32> -> vector<72x128xf32>
    %293 = vector.broadcast %7 : vector<1x128xf32> to vector<72x128xf32>
    %294 = arith.addf %292, %293 : vector<72x128xf32>
    %295 = arith.negf %294 : vector<72x128xf32>
    %296 = math.exp %295 : vector<72x128xf32>
    %cst_58 = arith.constant 1.000000e+00 : f32
    %297 = vector.broadcast %cst_58 : f32 to vector<72x128xf32>
    %298 = arith.addf %297, %296 : vector<72x128xf32>
    %299 = arith.divf %297, %298 : vector<72x128xf32>
    %c0_59 = arith.constant 0 : index
    %c0_60 = arith.constant 0 : index
    %300 = vector.load %arg2[%c0_59, %c0_60] : memref<72x128xf32, #tpu.memory_space<vmem>>, vector<72x128xf32>
    tpu.vector_store %arg2[%c0_59, %c0_60], %299 {strides = array<i32>} : memref<72x128xf32, #tpu.memory_space<vmem>>, vector<72x128xf32>,
    return
  }
}

</mosaic_0001>

<bundles_post_ra>
// kernel: squeeze.1
= control target key start
LH: loop header
LB: loop body
LE: loop exit
PB: predicated region body
PF: predicated region fallthrough
CT: control target
= control target key end

     0   :  { %s66_s8 = smov 104   ;;  %vm7_vm0 = vcmask 64512   ;;  %s67_s11 = smov 112   ;;  %s117_s0 = inlined_call_operand.vmem [shape: f32[64], index: 0, kind: input, shape index: {}]   ;;  %s118_s1 = inlined_call_operand.vmem [shape: f32[8,8], index: 1, kind: output, shape index: {}]  }
   0x1   :  { %v4_v0 = vld [vmem:[%s117_s0] sm:$0x1]  ;;  %s65_s0 = smov 120   ;;  %s68_s12 = smov 96  }
   0x2   :  { %5 = vst [vmem:[#allocation0] sm:$0x1] %v4_v0  ;;  %s69_s13 = smov 88   ;;  %s70_s14 = smov 80  }
   0x3   :  { %s71_s15 = smov 72  }
   0x9   :  { %v9_v1 = vld [vmem:[#allocation0] sm:$0x1]  }
   0xa   :  { %v21_v2 = vld [vmem:[#allocation0] sm:$0x1]   ;;  %10 = vrot.lane.b32.xlu0 %v9_v1, %s65_s0 }
   0xb   :  { %22 = vrot.lane.b32.xlu1 %v21_v2, %s66_s8  ;;  %v15_v3 = vld [vmem:[#allocation0] sm:$0x1]  }
   0xc   :  { %v27_v4 = vld [vmem:[#allocation0] sm:$0x1]  }
   0xd   :  { %v6_v5 = vld [vmem:[#allocation0] sm:$0x1]  }
   0xe   :  { %8 = vst.msk [vmem:[%s118_s1] sm:$0x1] %vm7_vm0, %v6_v5   ;;  %16 = vrot.lane.b32.xlu0 %v15_v3, %s67_s11  ;;  %v33_v6 = vld [vmem:[#allocation0] sm:$0x1]  }
   0xf   :  { %28 = vrot.lane.b32.xlu1 %v27_v4, %s68_s12  ;;  %v39_v7 = vld [vmem:[#allocation0] sm:$0x1]  }
  0x10   :  { %v45_v8 = vld [vmem:[#allocation0] sm:$0x1]  }
  0x12   :  { %34 = vrot.lane.b32.xlu0 %v33_v6, %s69_s13 }
  0x13   :  { %40 = vrot.lane.b32.xlu1 %v39_v7, %s70_s14 }
  0x16   :  { %46 = vrot.lane.b32.xlu0 %v45_v8, %s71_s15 }
  0x7c   :  { %v11_v9 = vpop.permute.xlu0 %10  }
  0x7d   :  { %v23_v10 = vpop.permute.xlu1 %22   ;;  %51 = vst.msk [vmem:[%s118_s1 + $0x1] sm:$0x1] %vm7_vm0, %v11_v9  }
  0x7e   :  { %53 = vst.msk [vmem:[%s118_s1 + $0x3] sm:$0x1] %vm7_vm0, %v23_v10  }
  0x80   :  { %v17_v11 = vpop.permute.xlu0 %16  }
  0x81   :  { %v29_v12 = vpop.permute.xlu1 %28   ;;  %52 = vst.msk [vmem:[%s118_s1 + $0x2] sm:$0x1] %vm7_vm0, %v17_v11  }
  0x82   :  { %54 = vst.msk [vmem:[%s118_s1 + $0x4] sm:$0x1] %vm7_vm0, %v29_v12  }
  0x84   :  { %v35_v13 = vpop.permute.xlu0 %34  }
  0x85   :  { %v41_v14 = vpop.permute.xlu1 %40   ;;  %55 = vst.msk [vmem:[%s118_s1 + $0x5] sm:$0x1] %vm7_vm0, %v35_v13  }
  0x86   :  { %56 = vst.msk [vmem:[%s118_s1 + $0x6] sm:$0x1] %vm7_vm0, %v41_v14  }
  0x88   :  { %v47_v15 = vpop.permute.xlu0 %46  }
  0x89   :  { %57 = vst.msk [vmem:[%s118_s1 + $0x7] sm:$0x1] %vm7_vm0, %v47_v15  }

// kernel: navigation_forward.1
= control target key start
LH: loop header
LB: loop body
LE: loop exit
PB: predicated region body
PF: predicated region fallthrough
CT: control target
= control target key end

     0   :  { %v1956_v0 = vmov 0.0|0.0   ;;  %vm1957_vm0 = vmmov 0   ;;  %v1958_v4 = vmov 0.0   ;;  %vm53_vm1 = vcmask 523264   ;;  %s1959_s11 = smov 64   ;;  %s1960_s14 = smov 96   ;;  %s2381_s1 = inlined_call_operand.vmem [shape: f32[240,128], index: 1, kind: input, shape index: {}]   ;;  %s2382_s0 = inlined_call_operand.vmem [shape: f32[128,64], index: 0, kind: input, shape index: {}]   ;;  %s2383_s2 = inlined_call_operand.vmem [shape: f32[72,128], index: 2, kind: output, shape index: {}]  }
   0x1   :  { %1797 = vmatprep.subr.bf16.mxu1 %v1956_v0  ;;  %v11_v1 = vld [vmem:[%s2381_s1] sm:$0xff]  ;;  %v12_v2 = vld [vmem:[%s2381_s1 + $0x8] sm:$0xff]  ;;  %1619 = vmatprep.mubr.msk.f32.mxu1 %vm1957_vm0, %v1958_v4  ;;  %v13_v7 = vld [vmem:[%s2381_s1 + $0x10] sm:$0xff]  ;;  %vm195_vm2 = vcmask 261120   ;;  %s1961_s17 = smov 32   ;;  %vm1073_vm3 = vcmask 130048  }
   0x2   :  { %v19_v3 = vld [vmem:[%s2381_s1 + $0x40] sm:$0xff]  ;;  %v1781_v5 = vpack.c.bf16 %v12_v2, %v11_v1  ;;  %v20_v6 = vld [vmem:[%s2381_s1 + $0x48] sm:$0xff]  ;;  %v14_v8 = vld [vmem:[%s2381_s1 + $0x18] sm:$0xff]  ;;  %vm1236_vm4 = vcmask 654336  }
   0x3   :  { %v1998_v9 = vpack.c.bf16 %v20_v6, %v19_v3  ;;  %v1785_v10 = vpack.c.bf16 %v14_v8, %v13_v7  ;;  %v21_v11 = vld [vmem:[%s2381_s1 + $0x50] sm:$0xff]  ;;  %v22_v12 = vld [vmem:[%s2381_s1 + $0x58] sm:$0xff]  ;;  %v15_v13 = vld [vmem:[%s2381_s1 + $0x20] sm:$0xff] }
   0x4   :  { %1782 = vmatprep.subr.bf16.mxu0 %v1781_v5  ;;  %v16_v14 = vld [vmem:[%s2381_s1 + $0x28] sm:$0xff]  ;;  %v2013_v15 = vpack.c.bf16 %v22_v12, %v21_v11  ;;  %v41_v16 = vld [vmem:[%s2382_s0] sm:$0xff]  ;;  %v17_v18 = vld [vmem:[%s2381_s1 + $0x30] sm:$0xff] }
   0x5   :  { %1799 = vmatpush3.bf16.msra.mxu1 %v1998_v9  ;;  %1784 = vmatpush3.bf16.msra.mxu0 %v1781_v5  ;;  %v1789_v17 = vpack.c.bf16 %v16_v14, %v15_v13  ;;  %v18_v19 = vld [vmem:[%s2381_s1 + $0x38] sm:$0xff]  ;;  %v42_v21 = vld [vmem:[%s2382_s0 + $0x8] sm:$0xff]  ;;  %v2054_v28 = vld [vmem:[%s2381_s1 + $0x60] ss:$0 sm:$0xff] }
   0x6   :  { %1800 = vmatprep.subr.bf16.mxu1 %v1956_v0  ;;  %1786 = vmatprep.subr.bf16.mxu0 %v1785_v10  ;;  %v1793_v20 = vpack.c.bf16 %v18_v19, %v17_v18  ;;  %v2047_v22 = vld [vmem:[%s2381_s1 + $0x68] ss:$0 sm:$0xff]  ;;  %v183_v45 = vld [vmem:[%s2382_s0 + $0x40] sm:$0xff]  ;;  %v43_v2 = vld [vmem:[%s2382_s0 + $0x10] sm:$0xff] }
   0x7   :  { %1599 = vmatprep.mubr.msk.f32.mxu0 %vm53_vm1, %v41_v16  ;;  %v300_v46 = vsub.f32 1.0, %v183_v45  ;;  %v44_v3 = vld [vmem:[%s2382_s0 + $0x18] sm:$0xff]  ;;  %v184_v12 = vld [vmem:[%s2382_s0 + $0x48] sm:$0xff] }
   0x8   :  { %v410_v13 = vsub.f32 1.0, %v184_v12 }
   0x9   :  { %1802 = vmatpush3.bf16.msra.mxu1 %v2013_v15  ;;  %1788 = vmatpush3.bf16.msra.mxu0 %v1785_v10  ;;  %v301_v47 = vmul.f32 0.0, %v300_v46 }
   0xa   :  { %1790 = vmatprep.subr.bf16.mxu0 %v1789_v17  ;;  %1803 = vmatprep.subr.bf16.mxu1 %v1956_v0 }
   0xc   :  { %1620 = vmatmul.mubr.f32.vlgmr.msra.gmra.mrb[0].mxu1 %v1958_v4 }
   0xd   :  { %1792 = vmatpush3.bf16.msra.mxu0 %v1789_v17  ;;  %1805 = vmatpush3.bf16.msra.mxu1 %v1998_v9 }
   0xe   :  { %1794 = vmatprep.subr.bf16.mxu0 %v1793_v20  ;;  %1806 = vmatprep.subr.bf16.mxu1 %v1956_v0 }
   0xf   :  { %1630 = vmatprep.mubr.msk.f32.mxu1 %vm1957_vm0, %v1958_v4 }
  0x11   :  { %1796 = vmatpush3.bf16.msra.mxu0 %v1793_v20  ;;  %1808 = vmatpush3.bf16.msra.mxu1 %v2013_v15 }
  0x12   :  { %1809 = vmatprep.subr.bf16.mxu1 %v1956_v0  ;;  %1827 = vmatprep.subr.bf16.mxu0 %v1956_v0 }
  0x14   :  { %1600 = vmatmul.mubr.msk.f32.vlgmr.msra.gmra.mrb[0].mxu0 %vm53_vm1, %v42_v21 }
  0x15   :  { %1829 = vmatpush3.bf16.msra.mxu0 %v1998_v9  ;;  %1602 = vmatprep.mubr.msk.f32.mxu0 %vm53_vm1, %v43_v2  ;;  %v46_v2 = vld [vmem:[%s2382_s0 + $0x28] sm:$0xff] }
  0x16   :  { %1830 = vmatprep.subr.bf16.mxu0 %v1956_v0 }
  0x18   :  { %1603 = vmatmul.mubr.msk.f32.gmra.mrb[2].mxu0 %vm53_vm1, %v44_v3 }
  0x19   :  { %1832 = vmatpush3.bf16.msra.mxu0 %v2013_v15 }
  0x1a   :  { %1839 = vmatprep.subr.bf16.mxu0 %v1956_v0 }
  0xdf   :  { %v265_v23 = vpop.f32.mrb[0].mxu1 }
  0xe0   :  { %v266_v24 = vadd.f32 %v2047_v22, %v265_v23  ;;  %v1621_v25 = vpop.f32.mrb[1].mxu1 }
  0xe2   :  { %277 = vrot.lane.b32.xlu0 %v266_v24, %s1959_s11 }
  0xe7   :  { %v1601_v26 = vpop.f32.mrb[0].mxu0 }
  0xe8   :  { %v144_v27 = vpop.f32.mrb[1].mxu0  ;;  %v150_v54 = vadd.f32 %v1601_v26, %v2054_v28 }
  0xe9   :  { %v145_v29 = vadd.f32 %v2054_v28, %v144_v27 }
  0xeb   :  { %v269_v30 = vadd.f32 %v266_v24, %v145_v29  ;;  %v1604_v19 = vpop.f32.mrb[2].mxu0 }
  0xec   :  { %v154_v20 = vpop.f32.mrb[3].mxu0 }
  0xed   :  { %v1451_v31 = vmul.f32 -1.442695, %v269_v30  ;;  %v155_v25 = vadd.f32 %v2054_v28, %v154_v20 }
  0xef   :  { %1872 = vpow2.f32 %v1451_v31 }
  0xf9   :  { %v1873_v32 = vpop.eup %1872 }
  0xfa   :  { %v273_v33 = vadd.f32 1.0, %v1873_v32 }
  0xfc   :  { %1874 = vrcp.f32 %v273_v33 }
 0x106   :  { %v1875_v34 = vpop.eup %1874 }
 0x107   :  { %v287_v40 = vsub.f32 1.0, %v1875_v34  ;;  %v293_v42 = vmul.f32 0.0, %v1875_v34 }
 0x154   :  { %v278_v35 = vpop.permute.xlu0 %277 }
 0x155   :  { %v280_v36 = vmul.f32 %v1875_v34, %v278_v35 }
 0x157   :  { %282 = vrot.lane.b32.xlu0 %v280_v36, %s1959_s11 }
 0x1c9   :  { %v283_v37 = vpop.permute.xlu0 %282 }
 0x1ca   :  { %v285_v38 = vadd.f32 %v283_v37, %v145_v29 }
 0x1cc   :  { %1876 = vtanh.f32 %v285_v38 }
 0x1d6   :  { %v1877_v39 = vpop.eup %1876 }
 0x1d7   :  { %289 = vrot.lane.b32.xlu1 %v1877_v39, %s1960_s14 }
 0x249   :  { %v290_v41 = vpop.permute.xlu1 %289 }
 0x24a   :  { %v292_v43 = vmul.f32 %v290_v41, %v287_v40 }
 0x24c   :  { %v294_v44 = vadd.f32 %v293_v42, %v292_v43  ;;  %v185_v43 = vld [vmem:[%s2382_s0 + $0x50] sm:$0xff] }
 0x24e   :  { %296 = vrot.lane.b32.xlu1 %v294_v44, %s1960_s14  ;;  %v520_v44 = vsub.f32 1.0, %v185_v43 }
 0x2c0   :  { %v297_v48 = vpop.permute.xlu1 %296 }
 0x2c1   :  { %v2063_v49 = vmul.f32 %v297_v48, %v183_v45 }
 0x2c3   :  { %v302_v50 = vadd.f32 %v301_v47, %v2063_v49 }
 0x2c5   :  { %1631 = vmatmul.mubr.msk.f32.vlgmr.msra.gmra.mrb[2].mxu1 %vm195_vm2, %v302_v50  ;;  %v411_v16 = vmul.f32 %v410_v13, %v302_v50 }
 0x2c6   :  { %1811 = vmatpush3.bf16.msra.mxu1 %v1998_v9  ;;  %1641 = vmatprep.mubr.msk.f32.mxu1 %vm1957_vm0, %v1958_v4 }
 0x2c7   :  { %1812 = vmatprep.subr.bf16.mxu1 %v1956_v0 }
 0x2ca   :  { %1814 = vmatpush3.bf16.msra.mxu1 %v2013_v15 }
 0x2cb   :  { %1815 = vmatprep.subr.bf16.mxu1 %v1956_v0 }
 0x398   :  { %v372_v51 = vpop.f32.mrb[2].mxu1 }
 0x399   :  { %v373_v52 = vadd.f32 %v2047_v22, %v372_v51  ;;  %v1632_v53 = vpop.f32.mrb[3].mxu1 }
 0x39a   :  { %v160_v53 = vadd.f32 %v1604_v19, %v2054_v28 }
 0x39b   :  { %384 = vrot.lane.b32.xlu0 %v373_v52, %s1959_s11  ;;  %v376_v55 = vadd.f32 %v373_v52, %v150_v54 }
 0x39d   :  { %v1453_v56 = vmul.f32 -1.442695, %v376_v55 }
 0x39f   :  { %1878 = vpow2.f32 %v1453_v56 }
 0x3a9   :  { %v1879_v57 = vpop.eup %1878 }
 0x3aa   :  { %v380_v58 = vadd.f32 1.0, %v1879_v57 }
 0x3ac   :  { %1880 = vrcp.f32 %v380_v58 }
 0x3b6   :  { %v1881_v59 = vpop.eup %1880 }
 0x3b7   :  { %v394_v6 = vsub.f32 1.0, %v1881_v59 }
 0x40d   :  { %v385_v60 = vpop.permute.xlu0 %384 }
 0x40e   :  { %v387_v61 = vmul.f32 %v1881_v59, %v385_v60 }
 0x410   :  { %389 = vrot.lane.b32.xlu1 %v387_v61, %s1959_s11 }
 0x414   :  { %400 = vrot.lane.b32.xlu1 %v302_v50, %s1961_s17 }
 0x482   :  { %v390_v62 = vpop.permute.xlu1 %389 }
 0x483   :  { %v392_v63 = vadd.f32 %v390_v62, %v150_v54 }
 0x485   :  { %1882 = vtanh.f32 %v392_v63 }
 0x486   :  { %v401_v5 = vpop.permute.xlu1 %400 }
 0x487   :  { %v403_v8 = vmul.f32 %v1881_v59, %v401_v5 }
 0x48f   :  { %v1883_v1 = vpop.eup %1882 }
 0x490   :  { %396 = vrot.lane.b32.xlu0 %v1883_v1, %s1960_s14  ;;  %v45_v1 = vld [vmem:[%s2382_s0 + $0x20] sm:$0xff] }
 0x491   :  { %1605 = vmatprep.mubr.msk.f32.mxu0 %vm53_vm1, %v45_v1 }
 0x492   :  { %1606 = vmatmul.mubr.msk.f32.gmra.mrb[4].mxu0 %vm53_vm1, %v46_v2 }
 0x502   :  { %v397_v7 = vpop.permute.xlu0 %396 }
 0x503   :  { %v399_v10 = vmul.f32 %v397_v7, %v394_v6 }
 0x505   :  { %v404_v11 = vadd.f32 %v403_v8, %v399_v10 }
 0x507   :  { %406 = vrot.lane.b32.xlu0 %v404_v11, %s1960_s14  ;;  %v186_v11 = vld [vmem:[%s2382_s0 + $0x58] sm:$0xff] }
 0x565   :  { %v1607_v19 = vpop.f32.mrb[4].mxu0 }
 0x566   :  { %v164_v20 = vpop.f32.mrb[5].mxu0 }
 0x579   :  { %v407_v14 = vpop.permute.xlu0 %406 }
 0x57a   :  { %v2091_v17 = vmul.f32 %v407_v14, %v184_v12  ;;  %v630_v12 = vsub.f32 1.0, %v186_v11 }
 0x57c   :  { %v412_v18 = vadd.f32 %v411_v16, %v2091_v17 }
 0x57e   :  { %1642 = vmatmul.mubr.msk.f32.vlgmr.msra.gmra.mrb[4].mxu1 %vm195_vm2, %v412_v18  ;;  %v521_v46 = vmul.f32 %v520_v44, %v412_v18 }
 0x57f   :  { %1817 = vmatpush3.bf16.msra.mxu1 %v1998_v9  ;;  %1652 = vmatprep.mubr.msk.f32.mxu1 %vm1957_vm0, %v1958_v4 }
 0x580   :  { %1818 = vmatprep.subr.bf16.mxu1 %v1956_v0 }
 0x583   :  { %1820 = vmatpush3.bf16.msra.mxu1 %v2013_v15 }
 0x584   :  { %1821 = vmatprep.subr.bf16.mxu1 %v1956_v0 }
 0x651   :  { %v482_v21 = vpop.f32.mrb[4].mxu1 }
 0x652   :  { %v483_v23 = vadd.f32 %v2047_v22, %v482_v21  ;;  %v1643_v24 = vpop.f32.mrb[5].mxu1 }
 0x654   :  { %494 = vrot.lane.b32.xlu1 %v483_v23, %s1959_s11  ;;  %v486_v26 = vadd.f32 %v483_v23, %v155_v25 }
 0x656   :  { %v1455_v27 = vmul.f32 -1.442695, %v486_v26 }
 0x658   :  { %1884 = vpow2.f32 %v1455_v27 }
 0x662   :  { %v1885_v29 = vpop.eup %1884 }
 0x663   :  { %v490_v30 = vadd.f32 1.0, %v1885_v29 }
 0x665   :  { %1886 = vrcp.f32 %v490_v30 }
 0x66f   :  { %v1887_v31 = vpop.eup %1886 }
 0x670   :  { %v504_v38 = vsub.f32 1.0, %v1887_v31 }
 0x6c6   :  { %v495_v32 = vpop.permute.xlu1 %494 }
 0x6c7   :  { %v497_v33 = vmul.f32 %v1887_v31, %v495_v32 }
 0x6c9   :  { %499 = vrot.lane.b32.xlu0 %v497_v33, %s1959_s11 }
 0x6cd   :  { %510 = vrot.lane.b32.xlu0 %v412_v18, %s1961_s17 }
 0x73b   :  { %v500_v34 = vpop.permute.xlu0 %499 }
 0x73c   :  { %v502_v35 = vadd.f32 %v500_v34, %v155_v25  ;;  %v165_v25 = vadd.f32 %v2054_v28, %v164_v20 }
 0x73e   :  { %1888 = vtanh.f32 %v502_v35 }
 0x73f   :  { %v511_v37 = vpop.permute.xlu0 %510 }
 0x740   :  { %v513_v40 = vmul.f32 %v1887_v31, %v511_v37  ;;  %v48_v37 = vld [vmem:[%s2382_s0 + $0x38] sm:$0xff] }
 0x748   :  { %v1889_v36 = vpop.eup %1888 }
 0x749   :  { %506 = vrot.lane.b32.xlu1 %v1889_v36, %s1960_s14  ;;  %v47_v36 = vld [vmem:[%s2382_s0 + $0x30] sm:$0xff] }
 0x74a   :  { %1608 = vmatprep.mubr.msk.f32.mxu0 %vm53_vm1, %v47_v36 }
 0x74b   :  { %1609 = vmatmul.mubr.msk.f32.gmra.mrb[6].mxu0 %vm53_vm1, %v48_v37 }
 0x74c   :  { %1674 = vmatprep.mubr.msk.f32.mxu0 %vm1957_vm0, %v1958_v4 }
 0x7bb   :  { %v507_v39 = vpop.permute.xlu1 %506 }
 0x7bc   :  { %v509_v41 = vmul.f32 %v507_v39, %v504_v38 }
 0x7be   :  { %v514_v42 = vadd.f32 %v513_v40, %v509_v41 }
 0x7c0   :  { %516 = vrot.lane.b32.xlu1 %v514_v42, %s1960_s14 }
 0x832   :  { %v517_v45 = vpop.permute.xlu1 %516 }
 0x833   :  { %v2111_v47 = vmul.f32 %v517_v45, %v185_v43  ;;  %v2166_v45 = vpop.f32.mrb[6].mxu0 }
 0x835   :  { %v522_v48 = vadd.f32 %v521_v46, %v2111_v47  ;;  %v174_v46 = vpop.f32.mrb[7].mxu0 }
 0x837   :  { %1653 = vmatmul.mubr.msk.f32.vlgmr.msra.gmra.mrb[6].mxu1 %vm195_vm2, %v522_v48  ;;  %v631_v14 = vmul.f32 %v630_v12, %v522_v48  ;;  %v188_v12 = vld [vmem:[%s2382_s0 + $0x68] sm:$0xff] }
 0x838   :  { %1823 = vmatpush3.bf16.msra.mxu1 %v1998_v9  ;;  %1663 = vmatprep.mubr.msk.f32.mxu1 %vm1957_vm0, %v1958_v4 }
 0x839   :  { %1824 = vmatprep.subr.bf16.mxu1 %v1956_v0 }
 0x83c   :  { %1826 = vmatpush3.bf16.msra.mxu1 %v2013_v15 }
 0x83d   :  { %1833 = vmatprep.subr.bf16.mxu1 %v1956_v0 }
 0x90a   :  { %v592_v50 = vpop.f32.mrb[6].mxu1 }
 0x90b   :  { %v593_v51 = vadd.f32 %v2047_v22, %v592_v50  ;;  %v1654_v52 = vpop.f32.mrb[7].mxu1 }
 0x90d   :  { %604 = vrot.lane.b32.xlu0 %v593_v51, %s1959_s11  ;;  %v596_v54 = vadd.f32 %v593_v51, %v160_v53 }
 0x90f   :  { %v1457_v55 = vmul.f32 -1.442695, %v596_v54 }
 0x911   :  { %1890 = vpow2.f32 %v1457_v55 }
 0x91b   :  { %v1891_v56 = vpop.eup %1890 }
 0x91c   :  { %v600_v57 = vadd.f32 1.0, %v1891_v56 }
 0x91e   :  { %1892 = vrcp.f32 %v600_v57 }
 0x928   :  { %v1893_v58 = vpop.eup %1892 }
 0x929   :  { %v614_v5 = vsub.f32 1.0, %v1893_v58 }
 0x97f   :  { %v605_v59 = vpop.permute.xlu0 %604 }
 0x980   :  { %v607_v60 = vmul.f32 %v1893_v58, %v605_v59 }
 0x982   :  { %609 = vrot.lane.b32.xlu1 %v607_v60, %s1959_s11 }
 0x986   :  { %620 = vrot.lane.b32.xlu1 %v522_v48, %s1961_s17  ;;  %v187_v48 = vld [vmem:[%s2382_s0 + $0x60] sm:$0xff] }
 0x987   :  { %v740_v50 = vsub.f32 1.0, %v187_v48 }
 0x9f4   :  { %v610_v61 = vpop.permute.xlu1 %609 }
 0x9f5   :  { %v612_v62 = vadd.f32 %v610_v61, %v160_v53 }
 0x9f7   :  { %1894 = vtanh.f32 %v612_v62 }
 0x9f8   :  { %v621_v3 = vpop.permute.xlu1 %620 }
 0x9f9   :  { %v623_v7 = vmul.f32 %v1893_v58, %v621_v3  ;;  %v170_v58 = vadd.f32 %v1607_v19, %v2054_v28 }
 0xa01   :  { %v1895_v63 = vpop.eup %1894 }
 0xa02   :  { %616 = vrot.lane.b32.xlu0 %v1895_v63, %s1960_s14 }
 0xa74   :  { %v617_v6 = vpop.permute.xlu0 %616 }
 0xa75   :  { %v619_v8 = vmul.f32 %v617_v6, %v614_v5 }
 0xa77   :  { %v624_v10 = vadd.f32 %v623_v7, %v619_v8 }
 0xa79   :  { %626 = vrot.lane.b32.xlu0 %v624_v10, %s1960_s14 }
 0xaeb   :  { %v627_v13 = vpop.permute.xlu0 %626 }
 0xaec   :  { %v2139_v16 = vmul.f32 %v627_v13, %v186_v11  ;;  %v850_v13 = vsub.f32 1.0, %v188_v12 }
 0xaee   :  { %v632_v18 = vadd.f32 %v631_v14, %v2139_v16 }
 0xaf0   :  { %1664 = vmatmul.mubr.msk.f32.vlgmr.msra.gmra.mrb[8].mxu1 %vm195_vm2, %v632_v18  ;;  %v741_v52 = vmul.f32 %v740_v50, %v632_v18 }
 0xaf1   :  { %1835 = vmatpush3.bf16.msra.mxu1 %v1998_v9  ;;  %1685 = vmatprep.mubr.msk.f32.mxu1 %vm1957_vm0, %v1958_v4 }
 0xaf2   :  { %1836 = vmatprep.subr.bf16.mxu1 %v1956_v0 }
 0xaf5   :  { %1838 = vmatpush3.bf16.msra.mxu1 %v2013_v15 }
 0xaf6   :  { %1845 = vmatprep.subr.bf16.mxu1 %v1956_v0 }
 0xbc3   :  { %v702_v21 = vpop.f32.mrb[8].mxu1 }
 0xbc4   :  { %v703_v23 = vadd.f32 %v2047_v22, %v702_v21  ;;  %v1665_v24 = vpop.f32.mrb[9].mxu1 }
 0xbc6   :  { %714 = vrot.lane.b32.xlu1 %v703_v23, %s1959_s11  ;;  %v706_v26 = vadd.f32 %v703_v23, %v165_v25 }
 0xbc8   :  { %v1459_v27 = vmul.f32 -1.442695, %v706_v26 }
 0xbca   :  { %1896 = vpow2.f32 %v1459_v27 }
 0xbd4   :  { %v1897_v29 = vpop.eup %1896 }
 0xbd5   :  { %v710_v30 = vadd.f32 1.0, %v1897_v29 }
 0xbd7   :  { %1898 = vrcp.f32 %v710_v30 }
 0xbe1   :  { %v1899_v31 = vpop.eup %1898 }
 0xbe2   :  { %v724_v40 = vsub.f32 1.0, %v1899_v31 }
 0xc38   :  { %v715_v32 = vpop.permute.xlu1 %714 }
 0xc39   :  { %v717_v33 = vmul.f32 %v1899_v31, %v715_v32 }
 0xc3b   :  { %719 = vrot.lane.b32.xlu0 %v717_v33, %s1959_s11 }
 0xc3f   :  { %730 = vrot.lane.b32.xlu0 %v632_v18, %s1961_s17 }
 0xcad   :  { %v720_v34 = vpop.permute.xlu0 %719 }
 0xcae   :  { %v722_v35 = vadd.f32 %v720_v34, %v165_v25  ;;  %v175_v25 = vadd.f32 %v2054_v28, %v174_v46 }
 0xcb0   :  { %1900 = vtanh.f32 %v722_v35 }
 0xcb1   :  { %v731_v39 = vpop.permute.xlu0 %730 }
 0xcb2   :  { %v733_v42 = vmul.f32 %v1899_v31, %v731_v39 }
 0xcba   :  { %v1901_v38 = vpop.eup %1900 }
 0xcbb   :  { %726 = vrot.lane.b32.xlu1 %v1901_v38, %s1960_s14 }
 0xd2d   :  { %v727_v41 = vpop.permute.xlu1 %726 }
 0xd2e   :  { %v729_v43 = vmul.f32 %v727_v41, %v724_v40 }
 0xd30   :  { %v734_v44 = vadd.f32 %v733_v42, %v729_v43  ;;  %v189_v43 = vld [vmem:[%s2382_s0 + $0x70] sm:$0xff] }
 0xd32   :  { %736 = vrot.lane.b32.xlu1 %v734_v44, %s1960_s14  ;;  %v960_v44 = vsub.f32 1.0, %v189_v43 }
 0xda4   :  { %v737_v51 = vpop.permute.xlu1 %736 }
 0xda5   :  { %v2171_v53 = vmul.f32 %v737_v51, %v187_v48 }
 0xda7   :  { %v742_v54 = vadd.f32 %v741_v52, %v2171_v53 }
 0xda9   :  { %1675 = vmatmul.mubr.msk.f32.vlgmr.msra.gmra.mrb[8].mxu0 %vm195_vm2, %v742_v54  ;;  %v851_v18 = vmul.f32 %v850_v13, %v742_v54  ;;  %v30_v13 = vld [vmem:[%s2381_s1 + $0x98] sm:$0xff] }
 0xdaa   :  { %1841 = vmatpush3.bf16.msra.mxu0 %v1998_v9  ;;  %1696 = vmatprep.mubr.msk.f32.mxu0 %vm1957_vm0, %v1958_v4 }
 0xdab   :  { %1842 = vmatprep.subr.bf16.mxu0 %v1956_v0 }
 0xdae   :  { %1844 = vmatpush3.bf16.msra.mxu0 %v2013_v15 }
 0xdaf   :  { %1851 = vmatprep.subr.bf16.mxu0 %v1956_v0 }
 0xe7c   :  { %v812_v55 = vpop.f32.mrb[8].mxu0 }
 0xe7d   :  { %v813_v56 = vadd.f32 %v2047_v22, %v812_v55  ;;  %v1676_v57 = vpop.f32.mrb[9].mxu0 }
 0xe7f   :  { %824 = vrot.lane.b32.xlu0 %v813_v56, %s1959_s11  ;;  %v816_v59 = vadd.f32 %v813_v56, %v170_v58  ;;  %v180_v56 = vadd.f32 %v2166_v45, %v2054_v28  ;;  %v25_v28 = vld [vmem:[%s2381_s1 + $0x70] sm:$0xff]  ;;  %v26_v45 = vld [vmem:[%s2381_s1 + $0x78] sm:$0xff] }
 0xe81   :  { %v1461_v60 = vmul.f32 -1.442695, %v816_v59 }
 0xe83   :  { %1902 = vpow2.f32 %v1461_v60 }
 0xe8d   :  { %v1903_v9 = vpop.eup %1902 }
 0xe8e   :  { %v820_v61 = vadd.f32 1.0, %v1903_v9 }
 0xe90   :  { %1904 = vrcp.f32 %v820_v61 }
 0xe9a   :  { %v1905_v62 = vpop.eup %1904 }
 0xe9b   :  { %v834_v6 = vsub.f32 1.0, %v1905_v62 }
 0xef1   :  { %v825_v63 = vpop.permute.xlu0 %824 }
 0xef2   :  { %v827_v1 = vmul.f32 %v1905_v62, %v825_v63 }
 0xef4   :  { %829 = vrot.lane.b32.xlu1 %v827_v1, %s1959_s11  ;;  %v1846_v1 = vpack.c.bf16 %v26_v45, %v25_v28 }
 0xef8   :  { %840 = vrot.lane.b32.xlu1 %v742_v54, %s1961_s17 }
 0xf66   :  { %v830_v15 = vpop.permute.xlu1 %829 }
 0xf67   :  { %v832_v2 = vadd.f32 %v830_v15, %v170_v58 }
 0xf69   :  { %1906 = vtanh.f32 %v832_v2  ;;  %v27_v2 = vld [vmem:[%s2381_s1 + $0x80] sm:$0xff] }
 0xf6a   :  { %v841_v5 = vpop.permute.xlu1 %840 }
 0xf6b   :  { %v843_v8 = vmul.f32 %v1905_v62, %v841_v5 }
 0xf73   :  { %v1907_v3 = vpop.eup %1906 }
 0xf74   :  { %836 = vrot.lane.b32.xlu0 %v1907_v3, %s1960_s14  ;;  %v28_v3 = vld [vmem:[%s2381_s1 + $0x88] sm:$0xff] }
 0xf75   :  { %v1849_v5 = vpack.c.bf16 %v28_v3, %v27_v2 }
 0xfe6   :  { %v837_v7 = vpop.permute.xlu0 %836 }
 0xfe7   :  { %v839_v10 = vmul.f32 %v837_v7, %v834_v6 }
 0xfe9   :  { %v844_v11 = vadd.f32 %v843_v8, %v839_v10 }
 0xfeb   :  { %846 = vrot.lane.b32.xlu0 %v844_v11, %s1960_s14 }
0x105d   :  { %v847_v14 = vpop.permute.xlu0 %846 }
0x105e   :  { %v2191_v19 = vmul.f32 %v847_v14, %v188_v12  ;;  %v31_v14 = vld [vmem:[%s2381_s1 + $0xa0] sm:$0xff] }
0x1060   :  { %v852_v20 = vadd.f32 %v851_v18, %v2191_v19  ;;  %v32_v18 = vld [vmem:[%s2381_s1 + $0xa8] sm:$0xff] }
0x1062   :  { %1686 = vmatmul.mubr.msk.f32.vlgmr.msra.gmra.mrb[10].mxu1 %vm195_vm2, %v852_v20  ;;  %v961_v48 = vmul.f32 %v960_v44, %v852_v20 }
0x1063   :  { %1707 = vmatprep.mubr.msk.f32.mxu1 %vm1957_vm0, %v1958_v4  ;;  %1847 = vmatpush3.bf16.msra.mxu1 %v1846_v1 }
0x1064   :  { %1848 = vmatprep.subr.bf16.mxu1 %v1956_v0 }
0x1067   :  { %1850 = vmatpush3.bf16.msra.mxu1 %v1849_v5 }
0x1135   :  { %v922_v21 = vpop.f32.mrb[10].mxu1 }
0x1136   :  { %v923_v23 = vadd.f32 %v2047_v22, %v922_v21  ;;  %v1687_v24 = vpop.f32.mrb[11].mxu1  ;;  %v33_v21 = vld [vmem:[%s2381_s1 + $0xb0] sm:$0xff] }
0x1137   :  { %v34_v24 = vld [vmem:[%s2381_s1 + $0xb8] sm:$0xff] }
0x1138   :  { %934 = vrot.lane.b32.xlu1 %v923_v23, %s1959_s11  ;;  %v926_v26 = vadd.f32 %v923_v23, %v175_v25  ;;  %v1855_v23 = vpack.c.bf16 %v33_v21, %v32_v18 }
0x113a   :  { %v1463_v27 = vmul.f32 -1.442695, %v926_v26 }
0x113c   :  { %1908 = vpow2.f32 %v1463_v27  ;;  %v36_v27 = vld [vmem:[%s2381_s1 + $0xc8] sm:$0xff] }
0x1146   :  { %v1909_v29 = vpop.eup %1908 }
0x1147   :  { %v930_v30 = vadd.f32 1.0, %v1909_v29  ;;  %v37_v29 = vld [vmem:[%s2381_s1 + $0xd0] sm:$0xff] }
0x1149   :  { %1910 = vrcp.f32 %v930_v30  ;;  %v1861_v30 = vpack.c.bf16 %v37_v29, %v36_v27 }
0x1153   :  { %v1911_v31 = vpop.eup %1910 }
0x1154   :  { %v944_v38 = vsub.f32 1.0, %v1911_v31 }
0x11aa   :  { %v935_v32 = vpop.permute.xlu1 %934 }
0x11ab   :  { %v937_v33 = vmul.f32 %v1911_v31, %v935_v32 }
0x11ad   :  { %939 = vrot.lane.b32.xlu0 %v937_v33, %s1959_s11 }
0x11b1   :  { %950 = vrot.lane.b32.xlu0 %v852_v20, %s1961_s17  ;;  %v1852_v20 = vpack.c.bf16 %v31_v14, %v30_v13 }
0x121f   :  { %v940_v34 = vpop.permute.xlu0 %939 }
0x1220   :  { %v942_v35 = vadd.f32 %v940_v34, %v175_v25  ;;  %v35_v25 = vld [vmem:[%s2381_s1 + $0xc0] sm:$0xff] }
0x1221   :  { %v1858_v26 = vpack.c.bf16 %v35_v25, %v34_v24 }
0x1222   :  { %1912 = vtanh.f32 %v942_v35 }
0x1223   :  { %v951_v37 = vpop.permute.xlu0 %950 }
0x1224   :  { %v953_v40 = vmul.f32 %v1911_v31, %v951_v37  ;;  %v190_v31 = vld [vmem:[%s2382_s0 + $0x78] sm:$0xff]  ;;  %v1078_v37 = vsel %vm1073_vm3, %v2171_v53, %v2139_v16 }
0x122c   :  { %v1913_v36 = vpop.eup %1912 }
0x122d   :  { %946 = vrot.lane.b32.xlu1 %v1913_v36, %s1960_s14  ;;  %v1077_v36 = vsel %vm1073_vm3, %v2139_v16, %v2171_v53 }
0x129f   :  { %v947_v39 = vpop.permute.xlu1 %946 }
0x12a0   :  { %v949_v41 = vmul.f32 %v947_v39, %v944_v38  ;;  %v1079_v38 = vsel %vm1073_vm3, %v2191_v19, %v2111_v47 }
0x12a2   :  { %v954_v42 = vadd.f32 %v953_v40, %v949_v41  ;;  %v1070_v40 = vsub.f32 1.0, %v190_v31 }
0x12a4   :  { %956 = vrot.lane.b32.xlu1 %v954_v42, %s1960_s14 }
0x1316   :  { %v957_v46 = vpop.permute.xlu1 %956 }
0x1317   :  { %v2207_v50 = vmul.f32 %v957_v46, %v189_v43 }
0x1319   :  { %v2210_v51 = vadd.f32 %v961_v48, %v2207_v50  ;;  %v1075_v35 = vsel %vm1073_vm3, %v2091_v17, %v2207_v50  ;;  %v1080_v39 = vsel %vm1073_vm3, %v2207_v50, %v2091_v17  ;;  %v38_v17 = vld [vmem:[%s2381_s1 + $0xd8] sm:$0xff] }
0x131b   :  { %1697 = vmatmul.mubr.msk.f32.vlgmr.msra.gmra.mrb[10].mxu0 %vm195_vm2, %v2210_v51 }
0x131c   :  { %1754 = vmatprep.mubr.msk.f32.mxu0 %vm1957_vm0, %v1958_v4  ;;  %1853 = vmatpush3.bf16.msra.mxu0 %v1852_v20  ;;  %v1476_v20 = vld [vmem:[%s2381_s1 + $0xe8] ss:$0 sm:$0xff] }
0x131d   :  { %1854 = vmatprep.subr.bf16.mxu0 %v1956_v0 }
0x1320   :  { %1856 = vmatpush3.bf16.msra.mxu0 %v1855_v23 }
0x1321   :  { %1857 = vmatprep.subr.bf16.mxu0 %v1956_v0 }
0x1324   :  { %1859 = vmatpush3.bf16.msra.mxu0 %v1858_v26 }
0x1325   :  { %1860 = vmatprep.subr.bf16.mxu0 %v1956_v0 }
0x1328   :  { %1862 = vmatpush3.bf16.msra.mxu0 %v1861_v30 }
0x1329   :  { %1863 = vmatprep.subr.bf16.mxu0 %v1956_v0  ;;  %v1076_v0 = vsel %vm1073_vm3, %v2111_v47, %v2191_v19  ;;  %v1071_v47 = vmul.f32 %v1070_v40, %v2210_v51  ;;  %v39_v19 = vld [vmem:[%s2381_s1 + $0xe0] sm:$0xff] }
0x132a   :  { %v1864_v41 = vpack.c.bf16 %v39_v19, %v38_v17 }
0x132c   :  { %1865 = vmatpush3.bf16.msra.mxu0 %v1864_v41 }
0x13ee   :  { %v1032_v52 = vpop.f32.mrb[10].mxu0 }
0x13ef   :  { %v1033_v54 = vadd.f32 %v2047_v22, %v1032_v52  ;;  %v1698_v55 = vpop.f32.mrb[11].mxu0 }
0x13f1   :  { %1044 = vrot.lane.b32.xlu0 %v1033_v54, %s1959_s11  ;;  %v1036_v57 = vadd.f32 %v1033_v54, %v180_v56 }
0x13f3   :  { %v1465_v58 = vmul.f32 -1.442695, %v1036_v57 }
0x13f5   :  { %1914 = vpow2.f32 %v1465_v58 }
0x13ff   :  { %v1915_v59 = vpop.eup %1914 }
0x1400   :  { %v1040_v60 = vadd.f32 1.0, %v1915_v59 }
0x1402   :  { %1916 = vrcp.f32 %v1040_v60 }
0x140c   :  { %v1917_v9 = vpop.eup %1916 }
0x140d   :  { %v1054_v7 = vsub.f32 1.0, %v1917_v9 }
0x1463   :  { %v1045_v61 = vpop.permute.xlu0 %1044 }
0x1464   :  { %v1047_v62 = vmul.f32 %v1917_v9, %v1045_v61 }
0x1466   :  { %1049 = vrot.lane.b32.xlu1 %v1047_v62, %s1959_s11 }
0x146a   :  { %1060 = vrot.lane.b32.xlu1 %v2210_v51, %s1961_s17 }
0x14d8   :  { %v1050_v22 = vpop.permute.xlu1 %1049 }
0x14d9   :  { %v1052_v63 = vadd.f32 %v1050_v22, %v180_v56 }
0x14db   :  { %1918 = vtanh.f32 %v1052_v63 }
0x14dc   :  { %v1061_v6 = vpop.permute.xlu1 %1060 }
0x14dd   :  { %v1063_v10 = vmul.f32 %v1917_v9, %v1061_v6 }
0x14e5   :  { %v1919_v15 = vpop.eup %1918 }
0x14e6   :  { %1056 = vrot.lane.b32.xlu0 %v1919_v15, %s1960_s14 }
0x1558   :  { %v1057_v8 = vpop.permute.xlu0 %1056 }
0x1559   :  { %v1059_v11 = vmul.f32 %v1057_v8, %v1054_v7 }
0x155b   :  { %v1064_v12 = vadd.f32 %v1063_v10, %v1059_v11 }
0x155d   :  { %1066 = vrot.lane.b32.xlu0 %v1064_v12, %s1960_s14 }
0x15cf   :  { %v1067_v32 = vpop.permute.xlu0 %1066 }
0x15d0   :  { %v1069_v33 = vmul.f32 %v1067_v32, %v190_v31 }
0x15d2   :  { %v1074_v34 = vsel %vm1073_vm3, %v2063_v49, %v1069_v33  ;;  %v1081_v16 = vsel %vm1073_vm3, %v1069_v33, %v2063_v49  ;;  %v1072_v53 = vadd.f32 %v1071_v47, %v1069_v33  ;;  %v1466_v49 = vld [vmem:[%s2381_s1 + $0x90] ss:$0 sm:$0xff] }
0x15d3   :  { %1708 = vmatmul.mubr.msk.f32.vlgmr.msra.gmra.mrb[12].mxu1 %vm195_vm2, %v1074_v34 }
0x15d4   :  { %1710 = vmatprep.mubr.msk.f32.mxu1 %vm1957_vm0, %v1958_v4 }
0x15d7   :  { %1711 = vmatmul.mubr.msk.f32.gmra.mrb[14].mxu1 %vm195_vm2, %v1075_v35 }
0x15d8   :  { %1713 = vmatprep.mubr.msk.f32.mxu1 %vm1957_vm0, %v1958_v4 }
0x15db   :  { %1714 = vmatmul.mubr.msk.f32.gmra.mrb[16].mxu1 %vm195_vm2, %v1076_v0 }
0x15dc   :  { %1716 = vmatprep.mubr.msk.f32.mxu1 %vm1957_vm0, %v1958_v4 }
0x15df   :  { %1717 = vmatmul.mubr.msk.f32.gmra.mrb[18].mxu1 %vm195_vm2, %v1077_v36 }
0x15e0   :  { %1719 = vmatprep.mubr.msk.f32.mxu1 %vm1957_vm0, %v1958_v4 }
0x15e3   :  { %1720 = vmatmul.mubr.msk.f32.gmra.mrb[20].mxu1 %vm195_vm2, %v1078_v37 }
0x15e4   :  { %1722 = vmatprep.mubr.msk.f32.mxu1 %vm1957_vm0, %v1958_v4 }
0x15e7   :  { %1723 = vmatmul.mubr.msk.f32.gmra.mrb[22].mxu1 %vm195_vm2, %v1079_v38 }
0x15e8   :  { %1725 = vmatprep.mubr.msk.f32.mxu1 %vm1957_vm0, %v1958_v4 }
0x15eb   :  { %1726 = vmatmul.mubr.msk.f32.gmra.mrb[24].mxu1 %vm195_vm2, %v1080_v39 }
0x15ec   :  { %1728 = vmatprep.mubr.msk.f32.mxu1 %vm1957_vm0, %v1958_v4 }
0x15ef   :  { %1729 = vmatmul.mubr.msk.f32.gmra.mrb[26].mxu1 %vm195_vm2, %v1081_v16 }
0x15f0   :  { %1731 = vmatprep.mubr.msk.f32.mxu1 %vm1957_vm0, %v1958_v4 }
0x15f3   :  { %1732 = vmatmul.mubr.msk.f32.gmra.mrb[28].mxu1 %vm195_vm2, %v1072_v53 }
0x16a6   :  { %v1179_v42 = vpop.f32.mrb[12].mxu1 }
0x16a7   :  { %v1180_v43 = vadd.f32 %v1466_v49, %v1179_v42  ;;  %v1709_v44 = vpop.f32.mrb[13].mxu1 }
0x16a9   :  { %v1223_v46 = vmax.f32 %v1180_v43, 0.0 }
0x16aa   :  { %v1184_v48 = vpop.f32.mrb[14].mxu1 }
0x16ab   :  { %v1185_v50 = vadd.f32 %v1466_v49, %v1184_v48  ;;  %v1712_v51 = vpop.f32.mrb[15].mxu1  ;;  %1755 = vmatmul.mubr.msk.f32.vlgmr.msra.gmra.mrb[12].mxu0 %vm1236_vm4, %v1223_v46 }
0x16ac   :  { %1757 = vmatprep.mubr.msk.f32.mxu0 %vm1957_vm0, %v1958_v4 }
0x16ad   :  { %v1224_v52 = vmax.f32 %v1185_v50, 0.0 }
0x16ae   :  { %v1189_v54 = vpop.f32.mrb[16].mxu1 }
0x16af   :  { %v1190_v55 = vadd.f32 %v1466_v49, %v1189_v54  ;;  %v1715_v56 = vpop.f32.mrb[17].mxu1  ;;  %1758 = vmatmul.mubr.msk.f32.gmra.mrb[14].mxu0 %vm1236_vm4, %v1224_v52 }
0x16b0   :  { %1760 = vmatprep.mubr.msk.f32.mxu0 %vm1957_vm0, %v1958_v4 }
0x16b1   :  { %v1225_v57 = vmax.f32 %v1190_v55, 0.0 }
0x16b2   :  { %v1194_v58 = vpop.f32.mrb[18].mxu1 }
0x16b3   :  { %v1195_v59 = vadd.f32 %v1466_v49, %v1194_v58  ;;  %v1718_v60 = vpop.f32.mrb[19].mxu1  ;;  %1761 = vmatmul.mubr.msk.f32.gmra.mrb[16].mxu0 %vm1236_vm4, %v1225_v57 }
0x16b4   :  { %1763 = vmatprep.mubr.msk.f32.mxu0 %vm1957_vm0, %v1958_v4 }
0x16b5   :  { %v1226_v9 = vmax.f32 %v1195_v59, 0.0 }
0x16b6   :  { %v1199_v61 = vpop.f32.mrb[20].mxu1 }
0x16b7   :  { %v1200_v62 = vadd.f32 %v1466_v49, %v1199_v61  ;;  %v1721_v22 = vpop.f32.mrb[21].mxu1  ;;  %1764 = vmatmul.mubr.msk.f32.gmra.mrb[18].mxu0 %vm1236_vm4, %v1226_v9 }
0x16b8   :  { %1766 = vmatprep.mubr.msk.f32.mxu0 %vm1957_vm0, %v1958_v4 }
0x16b9   :  { %v1227_v63 = vmax.f32 %v1200_v62, 0.0 }
0x16ba   :  { %v1204_v28 = vpop.f32.mrb[22].mxu1 }
0x16bb   :  { %v1205_v45 = vadd.f32 %v1466_v49, %v1204_v28  ;;  %v1724_v1 = vpop.f32.mrb[23].mxu1  ;;  %1767 = vmatmul.mubr.msk.f32.gmra.mrb[20].mxu0 %vm1236_vm4, %v1227_v63 }
0x16bc   :  { %1769 = vmatprep.mubr.msk.f32.mxu0 %vm1957_vm0, %v1958_v4 }
0x16bd   :  { %v1228_v15 = vmax.f32 %v1205_v45, 0.0 }
0x16be   :  { %v1209_v2 = vpop.f32.mrb[24].mxu1 }
0x16bf   :  { %v1210_v3 = vadd.f32 %v1466_v49, %v1209_v2  ;;  %v1727_v5 = vpop.f32.mrb[25].mxu1  ;;  %1770 = vmatmul.mubr.msk.f32.gmra.mrb[22].mxu0 %vm1236_vm4, %v1228_v15 }
0x16c0   :  { %1772 = vmatprep.mubr.msk.f32.mxu0 %vm1957_vm0, %v1958_v4 }
0x16c1   :  { %v1229_v6 = vmax.f32 %v1210_v3, 0.0 }
0x16c2   :  { %v1214_v7 = vpop.f32.mrb[26].mxu1 }
0x16c3   :  { %v1215_v8 = vadd.f32 %v1466_v49, %v1214_v7  ;;  %v1730_v10 = vpop.f32.mrb[27].mxu1  ;;  %1773 = vmatmul.mubr.msk.f32.gmra.mrb[24].mxu0 %vm1236_vm4, %v1229_v6 }
0x16c4   :  { %1775 = vmatprep.mubr.msk.f32.mxu0 %vm1957_vm0, %v1958_v4 }
0x16c5   :  { %v1230_v11 = vmax.f32 %v1215_v8, 0.0 }
0x16c6   :  { %v1219_v12 = vpop.f32.mrb[28].mxu1 }
0x16c7   :  { %v1220_v13 = vadd.f32 %v1466_v49, %v1219_v12  ;;  %v1733_v14 = vpop.f32.mrb[29].mxu1  ;;  %1776 = vmatmul.mubr.msk.f32.gmra.mrb[26].mxu0 %vm1236_vm4, %v1230_v11 }
0x16c8   :  { %1778 = vmatprep.mubr.msk.f32.mxu0 %vm1957_vm0, %v1958_v4 }
0x16c9   :  { %v1231_v18 = vmax.f32 %v1220_v13, 0.0 }
0x16cb   :  { %1779 = vmatmul.mubr.msk.f32.gmra.mrb[28].mxu0 %vm1236_vm4, %v1231_v18 }
0x177e   :  { %v1330_v21 = vpop.f32.mrb[12].mxu0 }
0x177f   :  { %v1331_v23 = vadd.f32 %v1476_v20, %v1330_v21  ;;  %v1756_v24 = vpop.f32.mrb[13].mxu0 }
0x1781   :  { %v1486_v25 = vmul.f32 -1.442695, %v1331_v23 }
0x1782   :  { %v1335_v26 = vpop.f32.mrb[14].mxu0 }
0x1783   :  { %1920 = vpow2.f32 %v1486_v25  ;;  %v1336_v27 = vadd.f32 %v1476_v20, %v1335_v26  ;;  %v1759_v29 = vpop.f32.mrb[15].mxu0 }
0x1785   :  { %v1487_v30 = vmul.f32 -1.442695, %v1336_v27 }
0x1786   :  { %v1340_v31 = vpop.f32.mrb[16].mxu0 }
0x1787   :  { %1922 = vpow2.f32 %v1487_v30  ;;  %v1341_v32 = vadd.f32 %v1476_v20, %v1340_v31  ;;  %v1762_v4 = vpop.f32.mrb[17].mxu0 }
0x1789   :  { %v1488_v33 = vmul.f32 -1.442695, %v1341_v32 }
0x178a   :  { %v1345_v34 = vpop.f32.mrb[18].mxu0 }
0x178b   :  { %1924 = vpow2.f32 %v1488_v33  ;;  %v1346_v35 = vadd.f32 %v1476_v20, %v1345_v34  ;;  %v1765_v0 = vpop.f32.mrb[19].mxu0 }
0x178d   :  { %v1921_v36 = vpop.eup %1920  ;;  %v1489_v37 = vmul.f32 -1.442695, %v1346_v35 }
0x178e   :  { %v1401_v38 = vadd.f32 1.0, %v1921_v36  ;;  %v1350_v39 = vpop.f32.mrb[20].mxu0 }
0x178f   :  { %1926 = vpow2.f32 %v1489_v37  ;;  %v1351_v40 = vadd.f32 %v1476_v20, %v1350_v39  ;;  %v1768_v16 = vpop.f32.mrb[21].mxu0 }
0x1790   :  { %1928 = vrcp.f32 %v1401_v38 }
0x1791   :  { %v1923_v47 = vpop.eup %1922  ;;  %v1490_v53 = vmul.f32 -1.442695, %v1351_v40 }
0x1792   :  { %v1402_v17 = vadd.f32 1.0, %v1923_v47  ;;  %v1355_v19 = vpop.f32.mrb[22].mxu0 }
0x1793   :  { %1930 = vpow2.f32 %v1490_v53  ;;  %v1356_v41 = vadd.f32 %v1476_v20, %v1355_v19  ;;  %v1771_v49 = vpop.f32.mrb[23].mxu0 }
0x1794   :  { %1932 = vrcp.f32 %v1402_v17 }
0x1795   :  { %v1925_v42 = vpop.eup %1924  ;;  %v1491_v43 = vmul.f32 -1.442695, %v1356_v41 }
0x1796   :  { %v1403_v44 = vadd.f32 1.0, %v1925_v42  ;;  %v1360_v46 = vpop.f32.mrb[24].mxu0 }
0x1797   :  { %1934 = vpow2.f32 %v1491_v43  ;;  %v1361_v48 = vadd.f32 %v1476_v20, %v1360_v46  ;;  %v1774_v50 = vpop.f32.mrb[25].mxu0 }
0x1798   :  { %1936 = vrcp.f32 %v1403_v44 }
0x1799   :  { %v1927_v51 = vpop.eup %1926  ;;  %v1492_v52 = vmul.f32 -1.442695, %v1361_v48 }
0x179a   :  { %v1929_v54 = vpop.eup %1928  ;;  %v1404_v55 = vadd.f32 1.0, %v1927_v51  ;;  %v1365_v56 = vpop.f32.mrb[26].mxu0 }
0x179b   :  { %1428 = vst [vmem:[%s2383_s2] sm:$0xff] %v1929_v54  ;;  %1938 = vpow2.f32 %v1492_v52  ;;  %v1366_v57 = vadd.f32 %v1476_v20, %v1365_v56  ;;  %v1777_v58 = vpop.f32.mrb[27].mxu0 }
0x179c   :  { %1940 = vrcp.f32 %v1404_v55 }
0x179d   :  { %v1931_v59 = vpop.eup %1930  ;;  %v1493_v60 = vmul.f32 -1.442695, %v1366_v57 }
0x179e   :  { %v1933_v9 = vpop.eup %1932  ;;  %v1405_v61 = vadd.f32 1.0, %v1931_v59  ;;  %v1370_v62 = vpop.f32.mrb[28].mxu0 }
0x179f   :  { %1429 = vst [vmem:[%s2383_s2 + $0x8] sm:$0xff] %v1933_v9  ;;  %1942 = vpow2.f32 %v1493_v60  ;;  %v1371_v22 = vadd.f32 %v1476_v20, %v1370_v62  ;;  %v1780_v63 = vpop.f32.mrb[29].mxu0 }
0x17a0   :  { %1944 = vrcp.f32 %v1405_v61 }
0x17a1   :  { %v1935_v28 = vpop.eup %1934  ;;  %v1494_v45 = vmul.f32 -1.442695, %v1371_v22 }
0x17a2   :  { %v1937_v1 = vpop.eup %1936  ;;  %v1406_v15 = vadd.f32 1.0, %v1935_v28 }
0x17a3   :  { %1430 = vst [vmem:[%s2383_s2 + $0x10] sm:$0xff] %v1937_v1  ;;  %1946 = vpow2.f32 %v1494_v45 }
0x17a4   :  { %1948 = vrcp.f32 %v1406_v15 }
0x17a5   :  { %v1939_v2 = vpop.eup %1938 }
0x17a6   :  { %v1941_v3 = vpop.eup %1940  ;;  %v1407_v5 = vadd.f32 1.0, %v1939_v2 }
0x17a7   :  { %1431 = vst [vmem:[%s2383_s2 + $0x18] sm:$0xff] %v1941_v3 }
0x17a8   :  { %1950 = vrcp.f32 %v1407_v5 }
0x17a9   :  { %v1943_v6 = vpop.eup %1942 }
0x17aa   :  { %v1945_v7 = vpop.eup %1944  ;;  %v1408_v8 = vadd.f32 1.0, %v1943_v6 }
0x17ab   :  { %1432 = vst [vmem:[%s2383_s2 + $0x20] sm:$0xff] %v1945_v7 }
0x17ac   :  { %1952 = vrcp.f32 %v1408_v8 }
0x17ad   :  { %v1947_v10 = vpop.eup %1946 }
0x17ae   :  { %v1949_v11 = vpop.eup %1948  ;;  %v1409_v12 = vadd.f32 1.0, %v1947_v10 }
0x17af   :  { %1433 = vst [vmem:[%s2383_s2 + $0x28] sm:$0xff] %v1949_v11 }
0x17b0   :  { %1954 = vrcp.f32 %v1409_v12 }
0x17b2   :  { %v1951_v13 = vpop.eup %1950 }
0x17b3   :  { %1434 = vst [vmem:[%s2383_s2 + $0x30] sm:$0xff] %v1951_v13 }
0x17b6   :  { %v1953_v14 = vpop.eup %1952 }
0x17b7   :  { %1435 = vst [vmem:[%s2383_s2 + $0x38] sm:$0xff] %v1953_v14 }
0x17ba   :  { %v1955_v18 = vpop.eup %1954 }
0x17bb   :  { %1436 = vst [vmem:[%s2383_s2 + $0x40] sm:$0xff] %v1955_v18 }

</bundles_post_ra>
